<compile_context>
chip_gen: v6e
topology: v6e:2x2x1
jax: 0.10.0
libtpu: 0.0.40
codegen_flags: <defaults>
</compile_context>

<pallas_src>
import functools

import jax
import jax.numpy as jnp
from jax.experimental import pallas as pl
from jax.experimental.pallas import tpu as pltpu

LN_EPS = 1e-5  # torch.nn.LayerNorm default


def _layernorm_fp32(x32, g, b):
    """LayerNorm in f32 (matches CLIP's fp32 LayerNorm subclass)."""
    mu = jnp.mean(x32, axis=-1, keepdims=True)
    var = jnp.mean((x32 - mu) ** 2, axis=-1, keepdims=True)
    return (x32 - mu) * jax.lax.rsqrt(var + LN_EPS) * g + b


def transformer_kernel(x_ref,
                       ln1_g_ref, ln1_b_ref,
                       wq_ref, wk_ref, wv_ref,
                       bq_ref, bk_ref, bv_ref,
                       wo_ref, bo_ref,
                       ln2_g_ref, ln2_b_ref,
                       wfc_ref, bfc_ref,
                       wpr_ref, bpr_ref,
                       o_ref,
                       xres_ref, q_sc, k_sc, v_sc, ctx_sc,
                       *, n_head, valid_len):
    layer = pl.program_id(1)
    Lp, E = xres_ref.shape
    d_head = E // n_head

    # First layer for this batch element: pull the residual stream into VMEM
    # scratch; it stays resident across all layers of the inner grid axis.
    @pl.when(layer == 0)
    def _():
        xres_ref[...] = x_ref[0].astype(jnp.float32)

    x = xres_ref[...]                                  # (Lp, E) f32

    # ---------------- attention branch ----------------
    h = _layernorm_fp32(x, ln1_g_ref[...], ln1_b_ref[...]).astype(jnp.bfloat16)

    # Q/K/V projections.  Weights arrive pre-transposed (ready for h @ W) and
    # the 1/sqrt(d_head) scale is already folded into the Q weights/bias.
    q_sc[...] = (jnp.dot(h, wq_ref[...], preferred_element_type=jnp.float32)
                 + bq_ref[...]).astype(jnp.bfloat16)
    k_sc[...] = (jnp.dot(h, wk_ref[...], preferred_element_type=jnp.float32)
                 + bk_ref[...]).astype(jnp.bfloat16)
    v_sc[...] = (jnp.dot(h, wv_ref[...], preferred_element_type=jnp.float32)
                 + bv_ref[...]).astype(jnp.bfloat16)

    # Key-padding bias (only emitted when the wrapper actually padded L).
    if valid_len < Lp:
        key_ok = jax.lax.broadcasted_iota(jnp.int32, (1, Lp), 1) < valid_len
        key_bias = jnp.where(key_ok, 0.0, -1e30).astype(jnp.float32)
    else:
        key_bias = None

    # Per-head attention.  Each iteration only loads its own lane slice of
    # q/k/v from VMEM scratch and stores its context back into ctx_sc, so no
    # per-head value survives an iteration (no f32 accumulator RMW chain).
    # n_head is small for CLIP-style models, so a static unroll is fine.
    # TODO(synk): for n_head >> 8 switch to lax.fori_loop with pl.ds lane
    # slices to bound code size / live ranges further.
    for hi in range(n_head):
        sl = slice(hi * d_head, (hi + 1) * d_head)
        qh = q_sc[:, sl]                               # (Lp, D) bf16
        kh = k_sc[:, sl]
        vh = v_sc[:, sl]
        # QK^T: contract last dims of both operands (no .T / XLU transpose).
        s = jax.lax.dot_general(qh, kh, (((1,), (1,)), ((), ())),
                                preferred_element_type=jnp.float32)  # (Lp, Lp)
        if key_bias is not None:
            s = s + key_bias
        s = s - jnp.max(s, axis=-1, keepdims=True)
        p = jnp.exp(s)
        p = p * pl.reciprocal(jnp.sum(p, axis=-1, keepdims=True), approx=True)
        ctx_sc[:, sl] = jnp.dot(p.astype(jnp.bfloat16), vh,
                                preferred_element_type=jnp.float32
                                ).astype(jnp.bfloat16)

    # Single full-width output projection:  concat_h(ctx_h) @ Wo  as one
    # (Lp,E)@(E,E) matmul (full MXU fill) instead of n_head K=d_head matmuls.
    attn = (jnp.dot(ctx_sc[...], wo_ref[...],
                    preferred_element_type=jnp.float32) + bo_ref[...])

    x = x + attn                                       # residual 1 (f32)

    # ---------------- MLP branch ----------------
    h2 = _layernorm_fp32(x, ln2_g_ref[...], ln2_b_ref[...]).astype(jnp.bfloat16)
    m = jnp.dot(h2, wfc_ref[...], preferred_element_type=jnp.float32) + bfc_ref[...]
    m = m * jax.nn.sigmoid(1.702 * m)                  # QuickGELU, f32 VPU/EUP
    m = (jnp.dot(m.astype(jnp.bfloat16), wpr_ref[...],
                 preferred_element_type=jnp.float32) + bpr_ref[...])

    x = x + m                                          # residual 2
    xres_ref[...] = x

    @pl.when(layer == pl.num_programs(1) - 1)
    def _():
        o_ref[0] = x.astype(o_ref.dtype)


def _prepare_layer(params, n_head, compute_dtype=jnp.bfloat16):
    """PyTorch-layout params -> kernel-layout params for one layer."""
    (ln1_g, ln1_b, w_in, b_in, w_out, b_out,
     ln2_g, ln2_b, w_fc, b_fc, w_proj, b_proj) = params
    E = ln1_g.shape[-1]
    d_head = E // n_head
    scale = 1.0 / float(d_head) ** 0.5

    wq = (w_in[0:E] * scale).T.astype(compute_dtype)         # (E, E)
    wk = w_in[E:2 * E].T.astype(compute_dtype)               # (E, E)
    wv = w_in[2 * E:3 * E].T.astype(compute_dtype)           # (E, E)
    bq = (b_in[:, 0:E] * scale).astype(jnp.float32)          # (1, E)
    bk = b_in[:, E:2 * E].astype(jnp.float32)
    bv = b_in[:, 2 * E:3 * E].astype(jnp.float32)
    wo = w_out.T.astype(compute_dtype)                       # (E, E)
    wfc = w_fc.T.astype(compute_dtype)                       # (E, 4E)
    wpr = w_proj.T.astype(compute_dtype)                     # (4E, E)

    return (ln1_g.astype(jnp.float32), ln1_b.astype(jnp.float32),
            wq, wk, wv, bq, bk, bv,
            wo, b_out.astype(jnp.float32),
            ln2_g.astype(jnp.float32), ln2_b.astype(jnp.float32),
            wfc, b_fc.astype(jnp.float32),
            wpr, b_proj.astype(jnp.float32))


def prepare_transformer_params(layer_params, n_head, compute_dtype=jnp.bfloat16):
    """One-time (model-load) weight preparation.  Do NOT call per forward:
    pre-transposes weights, folds 1/sqrt(d) into Q, casts matmul weights to
    bf16 and stacks every per-layer slab along a leading num_layers axis for
    the layer-fused kernel grid."""
    prepped = [_prepare_layer(p, n_head, compute_dtype) for p in layer_params]
    stacked = tuple(jnp.stack(field, axis=0) for field in zip(*prepped))
    return jax.device_put(stacked)


def _vmem_capacity_bytes():
    try:
        return int(pltpu.get_tpu_info().vmem_capacity_bytes)
    except Exception:
        return 128 * 1024 * 1024


def transformer_layers(x_nle, stacked_params, n_head, valid_len):
    """x_nle: (N, Lp, E).  grid=(batch, layer): the batch axis is 'parallel'
    (megacore / multi-TC), the layer axis is innermost and 'arbitrary'; the
    residual stream stays in VMEM scratch across layers and layer l+1 weight
    slabs are prefetched (double-buffered) while layer l computes."""
    N, Lp, E = x_nle.shape
    n_layers = int(stacked_params[0].shape[0])

    x_spec = pl.BlockSpec((1, Lp, E), lambda b, l: (b, 0, 0))

    def wspec(p):
        # One layer's slab per grid step, leading layer dim squeezed away.
        return pl.BlockSpec((None,) + tuple(p.shape[1:]), lambda b, l: (l, 0, 0))

    in_specs = [x_spec] + [wspec(p) for p in stacked_params]
    out_specs = pl.BlockSpec((1, Lp, E), lambda b, l: (b, 0, 0))

    scratch_shapes = [
        pltpu.VMEM((Lp, E), jnp.float32),    # resident residual stream
        pltpu.VMEM((Lp, E), jnp.bfloat16),   # q
        pltpu.VMEM((Lp, E), jnp.bfloat16),   # k
        pltpu.VMEM((Lp, E), jnp.bfloat16),   # v
        pltpu.VMEM((Lp, E), jnp.bfloat16),   # per-head contexts -> one Wo matmul
    ]

    # VMEM budget: double-buffered per-layer weight slabs (that is what hides
    # the weight DMA behind compute) + activation I/O + scratch + temporaries,
    # capped below the physical VMEM of the current chip with headroom.
    itemsz = jnp.dtype(x_nle.dtype).itemsize
    per_layer_w = sum((int(p.size) // int(p.shape[0])) * jnp.dtype(p.dtype).itemsize
                      for p in stacked_params)
    act_io = 2 * 2 * Lp * E * itemsz                    # x in + out, double-buffered
    scratch = (4 + 4 * 2) * Lp * E                      # f32 residual + 4 bf16 bufs
    temps = 8 * Lp * Lp + 4 * Lp * 4 * E + (2 << 20)    # scores, MLP hidden, slack
    needed = 2 * per_layer_w + act_io + scratch + temps
    cap = _vmem_capacity_bytes()
    vmem_limit = int(max(16 << 20, min(needed, int(cap * 0.85))))
    # TODO(synk): for very large E on v7x (2x weight slabs > ~48 MiB), single-
    # buffer / K-tile the MLP weights and add a query-tile parallel axis.

    kernel = functools.partial(transformer_kernel, n_head=n_head,
                               valid_len=valid_len)
    return pl.pallas_call(
        kernel,
        out_shape=jax.ShapeDtypeStruct((N, Lp, E), x_nle.dtype),
        grid=(N, n_layers),
        in_specs=in_specs,
        out_specs=out_specs,
        scratch_shapes=scratch_shapes,
        compiler_params=pltpu.CompilerParams(
            dimension_semantics=("parallel", "arbitrary"),
            vmem_limit_bytes=vmem_limit),
    )(x_nle, *stacked_params)


def _padded_seq_len(L):
    lp8 = ((L + 7) // 8) * 8
    lp128 = ((L + 127) // 128) * 128
    # Lane-dense scores / softmax when the extra masked keys stay under ~15%.
    if lp128 - L <= max(8, (15 * L) // 100):
        return lp128
    return lp8


def transformer_forward(x_lne, stacked_params, n_head):
    """Matches Transformer.forward.  x_lne: (L, N, E), PyTorch seq-first.
    `stacked_params` must come from prepare_transformer_params()."""
    L, N, E = x_lne.shape
    x = jnp.transpose(x_lne, (1, 0, 2))        # (N, L, E) for the kernel
    Lp = _padded_seq_len(L)
    if Lp != L:
        x = jnp.pad(x, ((0, 0), (0, Lp - L), (0, 0)))
    x = transformer_layers(x, stacked_params, n_head, valid_len=L)
    if Lp != L:
        x = x[:, :L, :]
    return jnp.transpose(x, (1, 0, 2))         # back to (L, N, E)


def init_transformer_params(key, width, layers):
    """Deterministic synthetic weights with the shapes nn.Module.__init__ implies."""
    E = width
    all_params = []
    for l in range(layers):
        ks = jax.random.split(jax.random.fold_in(key, l), 8)
        s = 0.02
        params = (
            jnp.ones((1, E), jnp.float32),                                   # ln_1.weight
            jnp.zeros((1, E), jnp.float32),                                  # ln_1.bias
            s * jax.random.normal(ks[0], (3 * E, E), jnp.float32),           # attn.in_proj_weight
            s * jax.random.normal(ks[1], (1, 3 * E), jnp.float32),           # attn.in_proj_bias
            s * jax.random.normal(ks[2], (E, E), jnp.float32),               # attn.out_proj.weight
            s * jax.random.normal(ks[3], (1, E), jnp.float32),               # attn.out_proj.bias
            jnp.ones((1, E), jnp.float32),                                   # ln_2.weight
            jnp.zeros((1, E), jnp.float32),                                  # ln_2.bias
            s * jax.random.normal(ks[4], (4 * E, E), jnp.float32),           # mlp.c_fc.weight
            s * jax.random.normal(ks[5], (1, 4 * E), jnp.float32),           # mlp.c_fc.bias
            s * jax.random.normal(ks[6], (E, 4 * E), jnp.float32),           # mlp.c_proj.weight
            s * jax.random.normal(ks[7], (1, E), jnp.float32),               # mlp.c_proj.bias
        )
        all_params.append(params)
    return all_params


def _reference_forward(x_lne, layer_params, n_head):
    """Pure-JAX f32 reference matching the PyTorch module (for validation)."""
    x = x_lne.astype(jnp.float32)              # (L, N, E)
    L, N, E = x.shape
    D = E // n_head
    scale = 1.0 / float(D) ** 0.5

    def ln(z, g, b):
        mu = jnp.mean(z, -1, keepdims=True)
        var = jnp.mean((z - mu) ** 2, -1, keepdims=True)
        return (z - mu) * jax.lax.rsqrt(var + LN_EPS) * g[0] + b[0]

    for p in layer_params:
        (ln1_g, ln1_b, w_in, b_in, w_out, b_out,
         ln2_g, ln2_b, w_fc, b_fc, w_proj, b_proj) = p
        h = ln(x, ln1_g, ln1_b)
        qkv = h @ w_in.T + b_in[0]             # (L, N, 3E)
        q, k, v = qkv[..., :E], qkv[..., E:2 * E], qkv[..., 2 * E:]

        def split(t):                          # (L,N,E) -> (N,H,L,D)
            return jnp.transpose(t.reshape(L, N, n_head, D), (1, 2, 0, 3))

        qh, kh, vh = split(q) * scale, split(k), split(v)
        s = jnp.einsum('nhld,nhmd->nhlm', qh, kh)
        pr = jax.nn.softmax(s, axis=-1)
        ctx = jnp.einsum('nhlm,nhmd->nhld', pr, vh)          # (N,H,L,D)
        ctx = jnp.transpose(ctx, (2, 0, 1, 3)).reshape(L, N, E)
        x = x + (ctx @ w_out.T + b_out[0])

        h2 = ln(x, ln2_g, ln2_b)
        m = h2 @ w_fc.T + b_fc[0]
        m = m * jax.nn.sigmoid(1.702 * m)
        x = x + (m @ w_proj.T + b_proj[0])
    return x


if __name__ == "__main__":
    width, layers, heads = 32, 2, 4
    seq, batch = 8, 2

    key = jax.random.PRNGKey(0)
    k_x, k_p = jax.random.split(key)

    # (L, N, E) — PyTorch nn.MultiheadAttention sequence-first convention.
    x = jax.random.normal(k_x, (seq, batch, width), jnp.float32)
    params = init_transformer_params(k_p, width, layers)

    # One-time weight preparation (hoisted out of the jitted forward path).
    kparams = prepare_transformer_params(params, heads)

    fwd = jax.jit(transformer_forward, static_argnums=(2,))
    out = jax.block_until_ready(fwd(x, kparams, heads))

    assert out.shape == (seq, batch, width)
    assert bool(jnp.all(jnp.isfinite(out)))

    # Loose check vs. a pure-JAX f32 reference (bf16 matmuls introduce small error).
    ref = _reference_forward(x, params, heads)
    max_err = float(jnp.max(jnp.abs(out - ref)))
    assert max_err < 5e-2, f"max abs error {max_err}"

    print("KERNEL_OK")
</pallas_src>

<mosaic_0001>
module attributes {stable_mosaic.version = 11 : i64} {
  func.func @transformer_kernel(%arg0: i32, %arg1: i32, %arg2: memref<1x8x32xf32, #tpu.memory_space<vmem>>, %arg3: memref<1x1x32xf32, #tpu.memory_space<vmem>>, %arg4: memref<1x1x32xf32, #tpu.memory_space<vmem>>, %arg5: memref<1x32x32xbf16, #tpu.memory_space<vmem>>, %arg6: memref<1x32x32xbf16, #tpu.memory_space<vmem>>, %arg7: memref<1x32x32xbf16, #tpu.memory_space<vmem>>, %arg8: memref<1x1x32xf32, #tpu.memory_space<vmem>>, %arg9: memref<1x1x32xf32, #tpu.memory_space<vmem>>, %arg10: memref<1x1x32xf32, #tpu.memory_space<vmem>>, %arg11: memref<1x32x32xbf16, #tpu.memory_space<vmem>>, %arg12: memref<1x1x32xf32, #tpu.memory_space<vmem>>, %arg13: memref<1x1x32xf32, #tpu.memory_space<vmem>>, %arg14: memref<1x1x32xf32, #tpu.memory_space<vmem>>, %arg15: memref<1x32x128xbf16, #tpu.memory_space<vmem>>, %arg16: memref<1x1x128xf32, #tpu.memory_space<vmem>>, %arg17: memref<1x128x32xbf16, #tpu.memory_space<vmem>>, %arg18: memref<1x1x32xf32, #tpu.memory_space<vmem>>, %arg19: memref<1x8x32xf32, #tpu.memory_space<vmem>>, %arg20: memref<8x32xf32, #tpu.memory_space<vmem>>, %arg21: memref<8x32xbf16, #tpu.memory_space<vmem>>, %arg22: memref<8x32xbf16, #tpu.memory_space<vmem>>, %arg23: memref<8x32xbf16, #tpu.memory_space<vmem>>, %arg24: memref<8x32xbf16, #tpu.memory_space<vmem>>) attributes {dimension_semantics = [#tpu.dimension_semantics<parallel>, #tpu.dimension_semantics<arbitrary>], iteration_bounds = array<i64: 2, 2>, scalar_prefetch = 0 : i64, scratch_operands = 5 : i64, tpu.core_type = #tpu.core_type<tc>, window_params = [{transform_indices = @transform_0, window_bounds = array<i64: 1, 8, 32>}, {transform_indices = @transform_1, window_bounds = array<i64: 1, 1, 32>}, {transform_indices = @transform_2, window_bounds = array<i64: 1, 1, 32>}, {transform_indices = @transform_3, window_bounds = array<i64: 1, 32, 32>}, {transform_indices = @transform_4, window_bounds = array<i64: 1, 32, 32>}, {transform_indices = @transform_5, window_bounds = array<i64: 1, 32, 32>}, {transform_indices = @transform_6, window_bounds = array<i64: 1, 1, 32>}, {transform_indices = @transform_7, window_bounds = array<i64: 1, 1, 32>}, {transform_indices = @transform_8, window_bounds = array<i64: 1, 1, 32>}, {transform_indices = @transform_9, window_bounds = array<i64: 1, 32, 32>}, {transform_indices = @transform_10, window_bounds = array<i64: 1, 1, 32>}, {transform_indices = @transform_11, window_bounds = array<i64: 1, 1, 32>}, {transform_indices = @transform_12, window_bounds = array<i64: 1, 1, 32>}, {transform_indices = @transform_13, window_bounds = array<i64: 1, 32, 128>}, {transform_indices = @transform_14, window_bounds = array<i64: 1, 1, 128>}, {transform_indices = @transform_15, window_bounds = array<i64: 1, 128, 32>}, {transform_indices = @transform_16, window_bounds = array<i64: 1, 1, 32>}, {transform_indices = @transform_17, window_bounds = array<i64: 1, 8, 32>}]} {
    %c0_i32 = arith.constant 0 : i32
    %0 = arith.cmpi eq, %arg1, %c0_i32 : i32
    %1 = arith.extui %0 : i1 to i32
    %c0_i32_0 = arith.constant 0 : i32
    %2 = arith.cmpi ne, %1, %c0_i32_0 : i32
    scf.if %2 {
      %c0_123 = arith.constant 0 : index
      %c0_124 = arith.constant 0 : index
      %c0_125 = arith.constant 0 : index
      %194 = vector.load %arg2[%c0_123, %c0_124, %c0_125] : memref<1x8x32xf32, #tpu.memory_space<vmem>>, vector<1x8x32xf32>
      %195 = vector.shape_cast %194 : vector<1x8x32xf32> to vector<8x32xf32>
      %c0_126 = arith.constant 0 : index
      %c0_127 = arith.constant 0 : index
      %196 = vector.load %arg20[%c0_126, %c0_127] : memref<8x32xf32, #tpu.memory_space<vmem>>, vector<8x32xf32>
      tpu.vector_store %arg20[%c0_126, %c0_127], %195 {strides = array<i32>} : memref<8x32xf32, #tpu.memory_space<vmem>>, vector<8x32xf32>,
    } else {
    }
    %c0 = arith.constant 0 : index
    %c0_1 = arith.constant 0 : index
    %3 = vector.load %arg20[%c0, %c0_1] : memref<8x32xf32, #tpu.memory_space<vmem>>, vector<8x32xf32>
    %c0_2 = arith.constant 0 : index
    %c0_3 = arith.constant 0 : index
    %c0_4 = arith.constant 0 : index
    %4 = vector.load %arg3[%c0_2, %c0_3, %c0_4] : memref<1x1x32xf32, #tpu.memory_space<vmem>>, vector<1x1x32xf32>
    %5 = vector.shape_cast %4 : vector<1x1x32xf32> to vector<1x32xf32>
    %c0_5 = arith.constant 0 : index
    %c0_6 = arith.constant 0 : index
    %c0_7 = arith.constant 0 : index
    %6 = vector.load %arg4[%c0_5, %c0_6, %c0_7] : memref<1x1x32xf32, #tpu.memory_space<vmem>>, vector<1x1x32xf32>
    %7 = vector.shape_cast %6 : vector<1x1x32xf32> to vector<1x32xf32>
    %cst = arith.constant dense<0.000000e+00> : vector<8xf32>
    %8 = vector.multi_reduction <add>, %3, %cst [1] : vector<8x32xf32> to vector<8xf32>
    %9 = vector.shape_cast %8 : vector<8xf32> to vector<8x1xf32>
    %cst_8 = arith.constant 3.200000e+01 : f32
    %10 = vector.broadcast %cst_8 : f32 to vector<8x1xf32>
    %11 = arith.divf %9, %10 : vector<8x1xf32>
    %12 = vector.broadcast %11 : vector<8x1xf32> to vector<8x32xf32>
    %13 = arith.subf %3, %12 : vector<8x32xf32>
    %14 = arith.mulf %13, %13 : vector<8x32xf32>
    %cst_9 = arith.constant dense<0.000000e+00> : vector<8xf32>
    %15 = vector.multi_reduction <add>, %14, %cst_9 [1] : vector<8x32xf32> to vector<8xf32>
    %16 = vector.shape_cast %15 : vector<8xf32> to vector<8x1xf32>
    %cst_10 = arith.constant 3.200000e+01 : f32
    %17 = vector.broadcast %cst_10 : f32 to vector<8x1xf32>
    %18 = arith.divf %16, %17 : vector<8x1xf32>
    %19 = vector.broadcast %11 : vector<8x1xf32> to vector<8x32xf32>
    %20 = arith.subf %3, %19 : vector<8x32xf32>
    %cst_11 = arith.constant 9.99999974E-6 : f32
    %21 = vector.broadcast %cst_11 : f32 to vector<8x1xf32>
    %22 = arith.addf %18, %21 : vector<8x1xf32>
    %23 = math.rsqrt %22 : vector<8x1xf32>
    %24 = vector.broadcast %23 : vector<8x1xf32> to vector<8x32xf32>
    %25 = arith.mulf %20, %24 : vector<8x32xf32>
    %26 = vector.broadcast %5 : vector<1x32xf32> to vector<8x32xf32>
    %27 = arith.mulf %25, %26 : vector<8x32xf32>
    %28 = vector.broadcast %7 : vector<1x32xf32> to vector<8x32xf32>
    %29 = arith.addf %27, %28 : vector<8x32xf32>
    %30 = arith.truncf %29 : vector<8x32xf32> to vector<8x32xbf16>
    %c0_12 = arith.constant 0 : index
    %c0_13 = arith.constant 0 : index
    %c0_14 = arith.constant 0 : index
    %31 = vector.load %arg5[%c0_12, %c0_13, %c0_14] : memref<1x32x32xbf16, #tpu.memory_space<vmem>>, vector<1x32x32xbf16>
    %32 = vector.shape_cast %31 : vector<1x32x32xbf16> to vector<32x32xbf16>
    %cst_15 = arith.constant dense<0.000000e+00> : vector<8x32xf32>
    %33 = tpu.matmul %30, %32, %cst_15 {dimension_numbers = #tpu.dot_dimension_numbers<[1], [0], [0], [1], [0, 0, 1, 1], [], []>} : vector<8x32xbf16>, vector<32x32xbf16>, vector<8x32xf32> -> vector<8x32xf32>
    %c0_16 = arith.constant 0 : index
    %c0_17 = arith.constant 0 : index
    %c0_18 = arith.constant 0 : index
    %34 = vector.load %arg8[%c0_16, %c0_17, %c0_18] : memref<1x1x32xf32, #tpu.memory_space<vmem>>, vector<1x1x32xf32>
    %35 = vector.shape_cast %34 : vector<1x1x32xf32> to vector<1x32xf32>
    %36 = vector.broadcast %35 : vector<1x32xf32> to vector<8x32xf32>
    %37 = arith.addf %33, %36 : vector<8x32xf32>
    %38 = arith.truncf %37 : vector<8x32xf32> to vector<8x32xbf16>
    %c0_19 = arith.constant 0 : index
    %c0_20 = arith.constant 0 : index
    %39 = vector.load %arg21[%c0_19, %c0_20] : memref<8x32xbf16, #tpu.memory_space<vmem>>, vector<8x32xbf16>
    tpu.vector_store %arg21[%c0_19, %c0_20], %38 {strides = array<i32>} : memref<8x32xbf16, #tpu.memory_space<vmem>>, vector<8x32xbf16>,
    %c0_21 = arith.constant 0 : index
    %c0_22 = arith.constant 0 : index
    %c0_23 = arith.constant 0 : index
    %40 = vector.load %arg6[%c0_21, %c0_22, %c0_23] : memref<1x32x32xbf16, #tpu.memory_space<vmem>>, vector<1x32x32xbf16>
    %41 = vector.shape_cast %40 : vector<1x32x32xbf16> to vector<32x32xbf16>
    %cst_24 = arith.constant dense<0.000000e+00> : vector<8x32xf32>
    %42 = tpu.matmul %30, %41, %cst_24 {dimension_numbers = #tpu.dot_dimension_numbers<[1], [0], [0], [1], [0, 0, 1, 1], [], []>} : vector<8x32xbf16>, vector<32x32xbf16>, vector<8x32xf32> -> vector<8x32xf32>
    %c0_25 = arith.constant 0 : index
    %c0_26 = arith.constant 0 : index
    %c0_27 = arith.constant 0 : index
    %43 = vector.load %arg9[%c0_25, %c0_26, %c0_27] : memref<1x1x32xf32, #tpu.memory_space<vmem>>, vector<1x1x32xf32>
    %44 = vector.shape_cast %43 : vector<1x1x32xf32> to vector<1x32xf32>
    %45 = vector.broadcast %44 : vector<1x32xf32> to vector<8x32xf32>
    %46 = arith.addf %42, %45 : vector<8x32xf32>
    %47 = arith.truncf %46 : vector<8x32xf32> to vector<8x32xbf16>
    %c0_28 = arith.constant 0 : index
    %c0_29 = arith.constant 0 : index
    %48 = vector.load %arg22[%c0_28, %c0_29] : memref<8x32xbf16, #tpu.memory_space<vmem>>, vector<8x32xbf16>
    tpu.vector_store %arg22[%c0_28, %c0_29], %47 {strides = array<i32>} : memref<8x32xbf16, #tpu.memory_space<vmem>>, vector<8x32xbf16>,
    %c0_30 = arith.constant 0 : index
    %c0_31 = arith.constant 0 : index
    %c0_32 = arith.constant 0 : index
    %49 = vector.load %arg7[%c0_30, %c0_31, %c0_32] : memref<1x32x32xbf16, #tpu.memory_space<vmem>>, vector<1x32x32xbf16>
    %50 = vector.shape_cast %49 : vector<1x32x32xbf16> to vector<32x32xbf16>
    %cst_33 = arith.constant dense<0.000000e+00> : vector<8x32xf32>
    %51 = tpu.matmul %30, %50, %cst_33 {dimension_numbers = #tpu.dot_dimension_numbers<[1], [0], [0], [1], [0, 0, 1, 1], [], []>} : vector<8x32xbf16>, vector<32x32xbf16>, vector<8x32xf32> -> vector<8x32xf32>
    %c0_34 = arith.constant 0 : index
    %c0_35 = arith.constant 0 : index
    %c0_36 = arith.constant 0 : index
    %52 = vector.load %arg10[%c0_34, %c0_35, %c0_36] : memref<1x1x32xf32, #tpu.memory_space<vmem>>, vector<1x1x32xf32>
    %53 = vector.shape_cast %52 : vector<1x1x32xf32> to vector<1x32xf32>
    %54 = vector.broadcast %53 : vector<1x32xf32> to vector<8x32xf32>
    %55 = arith.addf %51, %54 : vector<8x32xf32>
    %56 = arith.truncf %55 : vector<8x32xf32> to vector<8x32xbf16>
    %c0_37 = arith.constant 0 : index
    %c0_38 = arith.constant 0 : index
    %57 = vector.load %arg23[%c0_37, %c0_38] : memref<8x32xbf16, #tpu.memory_space<vmem>>, vector<8x32xbf16>
    tpu.vector_store %arg23[%c0_37, %c0_38], %56 {strides = array<i32>} : memref<8x32xbf16, #tpu.memory_space<vmem>>, vector<8x32xbf16>,
    %c0_39 = arith.constant 0 : index
    %c0_40 = arith.constant 0 : index
    %58 = vector.load %arg21[%c0_39, %c0_40] : memref<8x32xbf16, #tpu.memory_space<vmem>>, vector<8x8xbf16>
    %c0_41 = arith.constant 0 : index
    %c0_42 = arith.constant 0 : index
    %59 = vector.load %arg22[%c0_41, %c0_42] : memref<8x32xbf16, #tpu.memory_space<vmem>>, vector<8x8xbf16>
    %c0_43 = arith.constant 0 : index
    %c0_44 = arith.constant 0 : index
    %60 = vector.load %arg23[%c0_43, %c0_44] : memref<8x32xbf16, #tpu.memory_space<vmem>>, vector<8x8xbf16>
    %cst_45 = arith.constant dense<0.000000e+00> : vector<8x8xf32>
    %61 = tpu.matmul %58, %59, %cst_45 {dimension_numbers = #tpu.dot_dimension_numbers<[1], [1], [0], [0], [0, 0, 1, 0], [], []>} : vector<8x8xbf16>, vector<8x8xbf16>, vector<8x8xf32> -> vector<8x8xf32>
    %cst_46 = arith.constant dense<0xFF800000> : vector<8xf32>
    %62 = vector.multi_reduction <maximumf>, %61, %cst_46 [1] : vector<8x8xf32> to vector<8xf32>
    %63 = vector.shape_cast %62 : vector<8xf32> to vector<8x1xf32>
    %64 = vector.broadcast %63 : vector<8x1xf32> to vector<8x8xf32>
    %65 = arith.subf %61, %64 : vector<8x8xf32>
    %66 = math.exp %65 : vector<8x8xf32>
    %cst_47 = arith.constant dense<0.000000e+00> : vector<8xf32>
    %67 = vector.multi_reduction <add>, %66, %cst_47 [1] : vector<8x8xf32> to vector<8xf32>
    %68 = vector.shape_cast %67 : vector<8xf32> to vector<8x1xf32>
    %69 = tpu.reciprocal %68 {approx = true} : vector<8x1xf32> -> vector<8x1xf32>
    %70 = vector.broadcast %69 : vector<8x1xf32> to vector<8x8xf32>
    %71 = arith.mulf %66, %70 : vector<8x8xf32>
    %72 = arith.truncf %71 : vector<8x8xf32> to vector<8x8xbf16>
    %cst_48 = arith.constant dense<0.000000e+00> : vector<8x8xf32>
    %73 = tpu.matmul %72, %60, %cst_48 {dimension_numbers = #tpu.dot_dimension_numbers<[1], [0], [0], [1], [0, 0, 1, 1], [], []>} : vector<8x8xbf16>, vector<8x8xbf16>, vector<8x8xf32> -> vector<8x8xf32>
    %74 = arith.truncf %73 : vector<8x8xf32> to vector<8x8xbf16>
    %c0_49 = arith.constant 0 : index
    %c0_50 = arith.constant 0 : index
    %75 = vector.load %arg24[%c0_49, %c0_50] : memref<8x32xbf16, #tpu.memory_space<vmem>>, vector<8x8xbf16>
    tpu.vector_store %arg24[%c0_49, %c0_50], %74 {strides = array<i32>} : memref<8x32xbf16, #tpu.memory_space<vmem>>, vector<8x8xbf16>,
    %c0_51 = arith.constant 0 : index
    %c8 = arith.constant 8 : index
    %76 = vector.load %arg21[%c0_51, %c8] : memref<8x32xbf16, #tpu.memory_space<vmem>>, vector<8x8xbf16>
    %c0_52 = arith.constant 0 : index
    %c8_53 = arith.constant 8 : index
    %77 = vector.load %arg22[%c0_52, %c8_53] : memref<8x32xbf16, #tpu.memory_space<vmem>>, vector<8x8xbf16>
    %c0_54 = arith.constant 0 : index
    %c8_55 = arith.constant 8 : index
    %78 = vector.load %arg23[%c0_54, %c8_55] : memref<8x32xbf16, #tpu.memory_space<vmem>>, vector<8x8xbf16>
    %cst_56 = arith.constant dense<0.000000e+00> : vector<8x8xf32>
    %79 = tpu.matmul %76, %77, %cst_56 {dimension_numbers = #tpu.dot_dimension_numbers<[1], [1], [0], [0], [0, 0, 1, 0], [], []>} : vector<8x8xbf16>, vector<8x8xbf16>, vector<8x8xf32> -> vector<8x8xf32>
    %cst_57 = arith.constant dense<0xFF800000> : vector<8xf32>
    %80 = vector.multi_reduction <maximumf>, %79, %cst_57 [1] : vector<8x8xf32> to vector<8xf32>
    %81 = vector.shape_cast %80 : vector<8xf32> to vector<8x1xf32>
    %82 = vector.broadcast %81 : vector<8x1xf32> to vector<8x8xf32>
    %83 = arith.subf %79, %82 : vector<8x8xf32>
    %84 = math.exp %83 : vector<8x8xf32>
    %cst_58 = arith.constant dense<0.000000e+00> : vector<8xf32>
    %85 = vector.multi_reduction <add>, %84, %cst_58 [1] : vector<8x8xf32> to vector<8xf32>
    %86 = vector.shape_cast %85 : vector<8xf32> to vector<8x1xf32>
    %87 = tpu.reciprocal %86 {approx = true} : vector<8x1xf32> -> vector<8x1xf32>
    %88 = vector.broadcast %87 : vector<8x1xf32> to vector<8x8xf32>
    %89 = arith.mulf %84, %88 : vector<8x8xf32>
    %90 = arith.truncf %89 : vector<8x8xf32> to vector<8x8xbf16>
    %cst_59 = arith.constant dense<0.000000e+00> : vector<8x8xf32>
    %91 = tpu.matmul %90, %78, %cst_59 {dimension_numbers = #tpu.dot_dimension_numbers<[1], [0], [0], [1], [0, 0, 1, 1], [], []>} : vector<8x8xbf16>, vector<8x8xbf16>, vector<8x8xf32> -> vector<8x8xf32>
    %92 = arith.truncf %91 : vector<8x8xf32> to vector<8x8xbf16>
    %c0_60 = arith.constant 0 : index
    %c8_61 = arith.constant 8 : index
    %93 = vector.load %arg24[%c0_60, %c8_61] : memref<8x32xbf16, #tpu.memory_space<vmem>>, vector<8x8xbf16>
    tpu.vector_store %arg24[%c0_60, %c8_61], %92 {strides = array<i32>} : memref<8x32xbf16, #tpu.memory_space<vmem>>, vector<8x8xbf16>,
    %c0_62 = arith.constant 0 : index
    %c16 = arith.constant 16 : index
    %94 = vector.load %arg21[%c0_62, %c16] : memref<8x32xbf16, #tpu.memory_space<vmem>>, vector<8x8xbf16>
    %c0_63 = arith.constant 0 : index
    %c16_64 = arith.constant 16 : index
    %95 = vector.load %arg22[%c0_63, %c16_64] : memref<8x32xbf16, #tpu.memory_space<vmem>>, vector<8x8xbf16>
    %c0_65 = arith.constant 0 : index
    %c16_66 = arith.constant 16 : index
    %96 = vector.load %arg23[%c0_65, %c16_66] : memref<8x32xbf16, #tpu.memory_space<vmem>>, vector<8x8xbf16>
    %cst_67 = arith.constant dense<0.000000e+00> : vector<8x8xf32>
    %97 = tpu.matmul %94, %95, %cst_67 {dimension_numbers = #tpu.dot_dimension_numbers<[1], [1], [0], [0], [0, 0, 1, 0], [], []>} : vector<8x8xbf16>, vector<8x8xbf16>, vector<8x8xf32> -> vector<8x8xf32>
    %cst_68 = arith.constant dense<0xFF800000> : vector<8xf32>
    %98 = vector.multi_reduction <maximumf>, %97, %cst_68 [1] : vector<8x8xf32> to vector<8xf32>
    %99 = vector.shape_cast %98 : vector<8xf32> to vector<8x1xf32>
    %100 = vector.broadcast %99 : vector<8x1xf32> to vector<8x8xf32>
    %101 = arith.subf %97, %100 : vector<8x8xf32>
    %102 = math.exp %101 : vector<8x8xf32>
    %cst_69 = arith.constant dense<0.000000e+00> : vector<8xf32>
    %103 = vector.multi_reduction <add>, %102, %cst_69 [1] : vector<8x8xf32> to vector<8xf32>
    %104 = vector.shape_cast %103 : vector<8xf32> to vector<8x1xf32>
    %105 = tpu.reciprocal %104 {approx = true} : vector<8x1xf32> -> vector<8x1xf32>
    %106 = vector.broadcast %105 : vector<8x1xf32> to vector<8x8xf32>
    %107 = arith.mulf %102, %106 : vector<8x8xf32>
    %108 = arith.truncf %107 : vector<8x8xf32> to vector<8x8xbf16>
    %cst_70 = arith.constant dense<0.000000e+00> : vector<8x8xf32>
    %109 = tpu.matmul %108, %96, %cst_70 {dimension_numbers = #tpu.dot_dimension_numbers<[1], [0], [0], [1], [0, 0, 1, 1], [], []>} : vector<8x8xbf16>, vector<8x8xbf16>, vector<8x8xf32> -> vector<8x8xf32>
    %110 = arith.truncf %109 : vector<8x8xf32> to vector<8x8xbf16>
    %c0_71 = arith.constant 0 : index
    %c16_72 = arith.constant 16 : index
    %111 = vector.load %arg24[%c0_71, %c16_72] : memref<8x32xbf16, #tpu.memory_space<vmem>>, vector<8x8xbf16>
    tpu.vector_store %arg24[%c0_71, %c16_72], %110 {strides = array<i32>} : memref<8x32xbf16, #tpu.memory_space<vmem>>, vector<8x8xbf16>,
    %c0_73 = arith.constant 0 : index
    %c24 = arith.constant 24 : index
    %112 = vector.load %arg21[%c0_73, %c24] : memref<8x32xbf16, #tpu.memory_space<vmem>>, vector<8x8xbf16>
    %c0_74 = arith.constant 0 : index
    %c24_75 = arith.constant 24 : index
    %113 = vector.load %arg22[%c0_74, %c24_75] : memref<8x32xbf16, #tpu.memory_space<vmem>>, vector<8x8xbf16>
    %c0_76 = arith.constant 0 : index
    %c24_77 = arith.constant 24 : index
    %114 = vector.load %arg23[%c0_76, %c24_77] : memref<8x32xbf16, #tpu.memory_space<vmem>>, vector<8x8xbf16>
    %cst_78 = arith.constant dense<0.000000e+00> : vector<8x8xf32>
    %115 = tpu.matmul %112, %113, %cst_78 {dimension_numbers = #tpu.dot_dimension_numbers<[1], [1], [0], [0], [0, 0, 1, 0], [], []>} : vector<8x8xbf16>, vector<8x8xbf16>, vector<8x8xf32> -> vector<8x8xf32>
    %cst_79 = arith.constant dense<0xFF800000> : vector<8xf32>
    %116 = vector.multi_reduction <maximumf>, %115, %cst_79 [1] : vector<8x8xf32> to vector<8xf32>
    %117 = vector.shape_cast %116 : vector<8xf32> to vector<8x1xf32>
    %118 = vector.broadcast %117 : vector<8x1xf32> to vector<8x8xf32>
    %119 = arith.subf %115, %118 : vector<8x8xf32>
    %120 = math.exp %119 : vector<8x8xf32>
    %cst_80 = arith.constant dense<0.000000e+00> : vector<8xf32>
    %121 = vector.multi_reduction <add>, %120, %cst_80 [1] : vector<8x8xf32> to vector<8xf32>
    %122 = vector.shape_cast %121 : vector<8xf32> to vector<8x1xf32>
    %123 = tpu.reciprocal %122 {approx = true} : vector<8x1xf32> -> vector<8x1xf32>
    %124 = vector.broadcast %123 : vector<8x1xf32> to vector<8x8xf32>
    %125 = arith.mulf %120, %124 : vector<8x8xf32>
    %126 = arith.truncf %125 : vector<8x8xf32> to vector<8x8xbf16>
    %cst_81 = arith.constant dense<0.000000e+00> : vector<8x8xf32>
    %127 = tpu.matmul %126, %114, %cst_81 {dimension_numbers = #tpu.dot_dimension_numbers<[1], [0], [0], [1], [0, 0, 1, 1], [], []>} : vector<8x8xbf16>, vector<8x8xbf16>, vector<8x8xf32> -> vector<8x8xf32>
    %128 = arith.truncf %127 : vector<8x8xf32> to vector<8x8xbf16>
    %c0_82 = arith.constant 0 : index
    %c24_83 = arith.constant 24 : index
    %129 = vector.load %arg24[%c0_82, %c24_83] : memref<8x32xbf16, #tpu.memory_space<vmem>>, vector<8x8xbf16>
    tpu.vector_store %arg24[%c0_82, %c24_83], %128 {strides = array<i32>} : memref<8x32xbf16, #tpu.memory_space<vmem>>, vector<8x8xbf16>,
    %c0_84 = arith.constant 0 : index
    %c0_85 = arith.constant 0 : index
    %130 = vector.load %arg24[%c0_84, %c0_85] : memref<8x32xbf16, #tpu.memory_space<vmem>>, vector<8x32xbf16>
    %c0_86 = arith.constant 0 : index
    %c0_87 = arith.constant 0 : index
    %c0_88 = arith.constant 0 : index
    %131 = vector.load %arg11[%c0_86, %c0_87, %c0_88] : memref<1x32x32xbf16, #tpu.memory_space<vmem>>, vector<1x32x32xbf16>
    %132 = vector.shape_cast %131 : vector<1x32x32xbf16> to vector<32x32xbf16>
    %cst_89 = arith.constant dense<0.000000e+00> : vector<8x32xf32>
    %133 = tpu.matmul %130, %132, %cst_89 {dimension_numbers = #tpu.dot_dimension_numbers<[1], [0], [0], [1], [0, 0, 1, 1], [], []>} : vector<8x32xbf16>, vector<32x32xbf16>, vector<8x32xf32> -> vector<8x32xf32>
    %c0_90 = arith.constant 0 : index
    %c0_91 = arith.constant 0 : index
    %c0_92 = arith.constant 0 : index
    %134 = vector.load %arg12[%c0_90, %c0_91, %c0_92] : memref<1x1x32xf32, #tpu.memory_space<vmem>>, vector<1x1x32xf32>
    %135 = vector.shape_cast %134 : vector<1x1x32xf32> to vector<1x32xf32>
    %136 = vector.broadcast %135 : vector<1x32xf32> to vector<8x32xf32>
    %137 = arith.addf %133, %136 : vector<8x32xf32>
    %138 = arith.addf %3, %137 : vector<8x32xf32>
    %c0_93 = arith.constant 0 : index
    %c0_94 = arith.constant 0 : index
    %c0_95 = arith.constant 0 : index
    %139 = vector.load %arg13[%c0_93, %c0_94, %c0_95] : memref<1x1x32xf32, #tpu.memory_space<vmem>>, vector<1x1x32xf32>
    %140 = vector.shape_cast %139 : vector<1x1x32xf32> to vector<1x32xf32>
    %c0_96 = arith.constant 0 : index
    %c0_97 = arith.constant 0 : index
    %c0_98 = arith.constant 0 : index
    %141 = vector.load %arg14[%c0_96, %c0_97, %c0_98] : memref<1x1x32xf32, #tpu.memory_space<vmem>>, vector<1x1x32xf32>
    %142 = vector.shape_cast %141 : vector<1x1x32xf32> to vector<1x32xf32>
    %cst_99 = arith.constant dense<0.000000e+00> : vector<8xf32>
    %143 = vector.multi_reduction <add>, %138, %cst_99 [1] : vector<8x32xf32> to vector<8xf32>
    %144 = vector.shape_cast %143 : vector<8xf32> to vector<8x1xf32>
    %cst_100 = arith.constant 3.200000e+01 : f32
    %145 = vector.broadcast %cst_100 : f32 to vector<8x1xf32>
    %146 = arith.divf %144, %145 : vector<8x1xf32>
    %147 = vector.broadcast %146 : vector<8x1xf32> to vector<8x32xf32>
    %148 = arith.subf %138, %147 : vector<8x32xf32>
    %149 = arith.mulf %148, %148 : vector<8x32xf32>
    %cst_101 = arith.constant dense<0.000000e+00> : vector<8xf32>
    %150 = vector.multi_reduction <add>, %149, %cst_101 [1] : vector<8x32xf32> to vector<8xf32>
    %151 = vector.shape_cast %150 : vector<8xf32> to vector<8x1xf32>
    %cst_102 = arith.constant 3.200000e+01 : f32
    %152 = vector.broadcast %cst_102 : f32 to vector<8x1xf32>
    %153 = arith.divf %151, %152 : vector<8x1xf32>
    %154 = vector.broadcast %146 : vector<8x1xf32> to vector<8x32xf32>
    %155 = arith.subf %138, %154 : vector<8x32xf32>
    %cst_103 = arith.constant 9.99999974E-6 : f32
    %156 = vector.broadcast %cst_103 : f32 to vector<8x1xf32>
    %157 = arith.addf %153, %156 : vector<8x1xf32>
    %158 = math.rsqrt %157 : vector<8x1xf32>
    %159 = vector.broadcast %158 : vector<8x1xf32> to vector<8x32xf32>
    %160 = arith.mulf %155, %159 : vector<8x32xf32>
    %161 = vector.broadcast %140 : vector<1x32xf32> to vector<8x32xf32>
    %162 = arith.mulf %160, %161 : vector<8x32xf32>
    %163 = vector.broadcast %142 : vector<1x32xf32> to vector<8x32xf32>
    %164 = arith.addf %162, %163 : vector<8x32xf32>
    %165 = arith.truncf %164 : vector<8x32xf32> to vector<8x32xbf16>
    %c0_104 = arith.constant 0 : index
    %c0_105 = arith.constant 0 : index
    %c0_106 = arith.constant 0 : index
    %166 = vector.load %arg15[%c0_104, %c0_105, %c0_106] : memref<1x32x128xbf16, #tpu.memory_space<vmem>>, vector<1x32x128xbf16>
    %167 = vector.shape_cast %166 : vector<1x32x128xbf16> to vector<32x128xbf16>
    %cst_107 = arith.constant dense<0.000000e+00> : vector<8x128xf32>
    %168 = tpu.matmul %165, %167, %cst_107 {dimension_numbers = #tpu.dot_dimension_numbers<[1], [0], [0], [1], [0, 0, 1, 1], [], []>} : vector<8x32xbf16>, vector<32x128xbf16>, vector<8x128xf32> -> vector<8x128xf32>
    %c0_108 = arith.constant 0 : index
    %c0_109 = arith.constant 0 : index
    %c0_110 = arith.constant 0 : index
    %169 = vector.load %arg16[%c0_108, %c0_109, %c0_110] : memref<1x1x128xf32, #tpu.memory_space<vmem>>, vector<1x1x128xf32>
    %170 = vector.shape_cast %169 : vector<1x1x128xf32> to vector<1x128xf32>
    %171 = vector.broadcast %170 : vector<1x128xf32> to vector<8x128xf32>
    %172 = arith.addf %168, %171 : vector<8x128xf32>
    %cst_111 = arith.constant 1.702000e+00 : f32
    %173 = vector.broadcast %cst_111 : f32 to vector<8x128xf32>
    %174 = arith.mulf %173, %172 : vector<8x128xf32>
    %175 = arith.negf %174 : vector<8x128xf32>
    %176 = math.exp %175 : vector<8x128xf32>
    %cst_112 = arith.constant 1.000000e+00 : f32
    %177 = vector.broadcast %cst_112 : f32 to vector<8x128xf32>
    %178 = arith.addf %177, %176 : vector<8x128xf32>
    %179 = arith.divf %177, %178 : vector<8x128xf32>
    %180 = arith.mulf %172, %179 : vector<8x128xf32>
    %181 = arith.truncf %180 : vector<8x128xf32> to vector<8x128xbf16>
    %c0_113 = arith.constant 0 : index
    %c0_114 = arith.constant 0 : index
    %c0_115 = arith.constant 0 : index
    %182 = vector.load %arg17[%c0_113, %c0_114, %c0_115] : memref<1x128x32xbf16, #tpu.memory_space<vmem>>, vector<1x128x32xbf16>
    %183 = vector.shape_cast %182 : vector<1x128x32xbf16> to vector<128x32xbf16>
    %cst_116 = arith.constant dense<0.000000e+00> : vector<8x32xf32>
    %184 = tpu.matmul %181, %183, %cst_116 {dimension_numbers = #tpu.dot_dimension_numbers<[1], [0], [0], [1], [0, 0, 1, 1], [], []>} : vector<8x128xbf16>, vector<128x32xbf16>, vector<8x32xf32> -> vector<8x32xf32>
    %c0_117 = arith.constant 0 : index
    %c0_118 = arith.constant 0 : index
    %c0_119 = arith.constant 0 : index
    %185 = vector.load %arg18[%c0_117, %c0_118, %c0_119] : memref<1x1x32xf32, #tpu.memory_space<vmem>>, vector<1x1x32xf32>
    %186 = vector.shape_cast %185 : vector<1x1x32xf32> to vector<1x32xf32>
    %187 = vector.broadcast %186 : vector<1x32xf32> to vector<8x32xf32>
    %188 = arith.addf %184, %187 : vector<8x32xf32>
    %189 = arith.addf %138, %188 : vector<8x32xf32>
    %c0_120 = arith.constant 0 : index
    %c0_121 = arith.constant 0 : index
    %190 = vector.load %arg20[%c0_120, %c0_121] : memref<8x32xf32, #tpu.memory_space<vmem>>, vector<8x32xf32>
    tpu.vector_store %arg20[%c0_120, %c0_121], %189 {strides = array<i32>} : memref<8x32xf32, #tpu.memory_space<vmem>>, vector<8x32xf32>,
    %c1_i32 = arith.constant 1 : i32
    %191 = arith.cmpi eq, %arg1, %c1_i32 : i32
    %192 = arith.extui %191 : i1 to i32
    %c0_i32_122 = arith.constant 0 : i32
    %193 = arith.cmpi ne, %192, %c0_i32_122 : i32
    scf.if %193 {
      %c0_123 = arith.constant 0 : index
      %c0_124 = arith.constant 0 : index
      %c0_125 = arith.constant 0 : index
      %194 = vector.load %arg19[%c0_123, %c0_124, %c0_125] : memref<1x8x32xf32, #tpu.memory_space<vmem>>, vector<1x8x32xf32>
      %195 = vector.shape_cast %194 : vector<1x8x32xf32> to vector<8x32xf32>
      %196 = vector.shape_cast %189 : vector<8x32xf32> to vector<1x8x32xf32>
      tpu.vector_store %arg19[%c0_123, %c0_124, %c0_125], %196 {strides = array<i32>} : memref<1x8x32xf32, #tpu.memory_space<vmem>>, vector<1x8x32xf32>,
    } else {
    }
    return
  }
  func.func @transform_0(%arg0: i32, %arg1: i32) -> (i32, i32, i32) {
    %c0_i32 = arith.constant 0 : i32
    %c0_i32_0 = arith.constant 0 : i32
    %c0_i32_1 = arith.constant 0 : i32
    return %arg0, %c0_i32, %c0_i32_0 : i32, i32, i32
  }
  func.func @transform_1(%arg0: i32, %arg1: i32) -> (i32, i32, i32) {
    %c0_i32 = arith.constant 0 : i32
    %c0_i32_0 = arith.constant 0 : i32
    %c0_i32_1 = arith.constant 0 : i32
    return %arg1, %c0_i32, %c0_i32_0 : i32, i32, i32
  }
  func.func @transform_2(%arg0: i32, %arg1: i32) -> (i32, i32, i32) {
    %c0_i32 = arith.constant 0 : i32
    %c0_i32_0 = arith.constant 0 : i32
    %c0_i32_1 = arith.constant 0 : i32
    return %arg1, %c0_i32, %c0_i32_0 : i32, i32, i32
  }
  func.func @transform_3(%arg0: i32, %arg1: i32) -> (i32, i32, i32) {
    %c0_i32 = arith.constant 0 : i32
    %c0_i32_0 = arith.constant 0 : i32
    %c0_i32_1 = arith.constant 0 : i32
    return %arg1, %c0_i32, %c0_i32_0 : i32, i32, i32
  }
  func.func @transform_4(%arg0: i32, %arg1: i32) -> (i32, i32, i32) {
    %c0_i32 = arith.constant 0 : i32
    %c0_i32_0 = arith.constant 0 : i32
    %c0_i32_1 = arith.constant 0 : i32
    return %arg1, %c0_i32, %c0_i32_0 : i32, i32, i32
  }
  func.func @transform_5(%arg0: i32, %arg1: i32) -> (i32, i32, i32) {
    %c0_i32 = arith.constant 0 : i32
    %c0_i32_0 = arith.constant 0 : i32
    %c0_i32_1 = arith.constant 0 : i32
    return %arg1, %c0_i32, %c0_i32_0 : i32, i32, i32
  }
  func.func @transform_6(%arg0: i32, %arg1: i32) -> (i32, i32, i32) {
    %c0_i32 = arith.constant 0 : i32
    %c0_i32_0 = arith.constant 0 : i32
    %c0_i32_1 = arith.constant 0 : i32
    return %arg1, %c0_i32, %c0_i32_0 : i32, i32, i32
  }
  func.func @transform_7(%arg0: i32, %arg1: i32) -> (i32, i32, i32) {
    %c0_i32 = arith.constant 0 : i32
    %c0_i32_0 = arith.constant 0 : i32
    %c0_i32_1 = arith.constant 0 : i32
    return %arg1, %c0_i32, %c0_i32_0 : i32, i32, i32
  }
  func.func @transform_8(%arg0: i32, %arg1: i32) -> (i32, i32, i32) {
    %c0_i32 = arith.constant 0 : i32
    %c0_i32_0 = arith.constant 0 : i32
    %c0_i32_1 = arith.constant 0 : i32
    return %arg1, %c0_i32, %c0_i32_0 : i32, i32, i32
  }
  func.func @transform_9(%arg0: i32, %arg1: i32) -> (i32, i32, i32) {
    %c0_i32 = arith.constant 0 : i32
    %c0_i32_0 = arith.constant 0 : i32
    %c0_i32_1 = arith.constant 0 : i32
    return %arg1, %c0_i32, %c0_i32_0 : i32, i32, i32
  }
  func.func @transform_10(%arg0: i32, %arg1: i32) -> (i32, i32, i32) {
    %c0_i32 = arith.constant 0 : i32
    %c0_i32_0 = arith.constant 0 : i32
    %c0_i32_1 = arith.constant 0 : i32
    return %arg1, %c0_i32, %c0_i32_0 : i32, i32, i32
  }
  func.func @transform_11(%arg0: i32, %arg1: i32) -> (i32, i32, i32) {
    %c0_i32 = arith.constant 0 : i32
    %c0_i32_0 = arith.constant 0 : i32
    %c0_i32_1 = arith.constant 0 : i32
    return %arg1, %c0_i32, %c0_i32_0 : i32, i32, i32
  }
  func.func @transform_12(%arg0: i32, %arg1: i32) -> (i32, i32, i32) {
    %c0_i32 = arith.constant 0 : i32
    %c0_i32_0 = arith.constant 0 : i32
    %c0_i32_1 = arith.constant 0 : i32
    return %arg1, %c0_i32, %c0_i32_0 : i32, i32, i32
  }
  func.func @transform_13(%arg0: i32, %arg1: i32) -> (i32, i32, i32) {
    %c0_i32 = arith.constant 0 : i32
    %c0_i32_0 = arith.constant 0 : i32
    %c0_i32_1 = arith.constant 0 : i32
    return %arg1, %c0_i32, %c0_i32_0 : i32, i32, i32
  }
  func.func @transform_14(%arg0: i32, %arg1: i32) -> (i32, i32, i32) {
    %c0_i32 = arith.constant 0 : i32
    %c0_i32_0 = arith.constant 0 : i32
    %c0_i32_1 = arith.constant 0 : i32
    return %arg1, %c0_i32, %c0_i32_0 : i32, i32, i32
  }
  func.func @transform_15(%arg0: i32, %arg1: i32) -> (i32, i32, i32) {
    %c0_i32 = arith.constant 0 : i32
    %c0_i32_0 = arith.constant 0 : i32
    %c0_i32_1 = arith.constant 0 : i32
    return %arg1, %c0_i32, %c0_i32_0 : i32, i32, i32
  }
  func.func @transform_16(%arg0: i32, %arg1: i32) -> (i32, i32, i32) {
    %c0_i32 = arith.constant 0 : i32
    %c0_i32_0 = arith.constant 0 : i32
    %c0_i32_1 = arith.constant 0 : i32
    return %arg1, %c0_i32, %c0_i32_0 : i32, i32, i32
  }
  func.func @transform_17(%arg0: i32, %arg1: i32) -> (i32, i32, i32) {
    %c0_i32 = arith.constant 0 : i32
    %c0_i32_0 = arith.constant 0 : i32
    %c0_i32_1 = arith.constant 0 : i32
    return %arg0, %c0_i32, %c0_i32_0 : i32, i32, i32
  }
}

</mosaic_0001>

<bundles_post_ra>
// kernel: transformer_forward.1
= control target key start
LH: loop header
LB: loop body
LE: loop exit
PB: predicated region body
PF: predicated region fallthrough
CT: control target
= control target key end

     0   :  { %s2549_s24 = smov 0   ;;  %s2551_s25 = smov 0   ;;  %s2862_s0 = inlined_call_operand.vmem [shape: f32[2,8,32], index: 0, kind: input, shape index: {}]   ;;  %s2863_s1 = inlined_call_operand.vmem [shape: f32[2,1,32], index: 1, kind: input, shape index: {}]   ;;  %s2864_s2 = inlined_call_operand.vmem [shape: f32[2,1,32], index: 2, kind: input, shape index: {}]   ;;  %s2865_s3 = inlined_call_operand.vmem [shape: bf16[2,32,32], index: 3, kind: input, shape index: {}]   ;;  %s2866_s4 = inlined_call_operand.vmem [shape: bf16[2,32,32], index: 4, kind: input, shape index: {}]   ;;  %s2867_s5 = inlined_call_operand.vmem [shape: bf16[2,32,32], index: 5, kind: input, shape index: {}]   ;;  %s2868_s6 = inlined_call_operand.vmem [shape: f32[2,1,32], index: 6, kind: input, shape index: {}]   ;;  %s2869_s7 = inlined_call_operand.vmem [shape: f32[2,1,32], index: 7, kind: input, shape index: {}]   ;;  %s2870_s8 = inlined_call_operand.vmem [shape: f32[2,1,32], index: 8, kind: input, shape index: {}]   ;;  %s2871_s9 = inlined_call_operand.vmem [shape: bf16[2,32,32], index: 9, kind: input, shape index: {}]   ;;  %s2872_s10 = inlined_call_operand.vmem [shape: f32[2,1,32], index: 10, kind: input, shape index: {}]   ;;  %s2873_s11 = inlined_call_operand.vmem [shape: f32[2,1,32], index: 11, kind: input, shape index: {}]   ;;  %s2874_s12 = inlined_call_operand.vmem [shape: f32[2,1,32], index: 12, kind: input, shape index: {}]   ;;  %s2875_s13 = inlined_call_operand.vmem [shape: bf16[2,32,128], index: 13, kind: input, shape index: {}]   ;;  %s2876_s14 = inlined_call_operand.vmem [shape: f32[2,1,128], index: 14, kind: input, shape index: {}]   ;;  %s2877_s15 = inlined_call_operand.vmem [shape: bf16[2,128,32], index: 15, kind: input, shape index: {}]   ;;  %s2878_s16 = inlined_call_operand.vmem [shape: f32[2,1,32], index: 16, kind: input, shape index: {}]   ;;  %s2879_s17 = inlined_call_operand.vmem [shape: f32[2,8,32], index: 17, kind: output, shape index: {}]  }
   0x1   :  { %2885 = sst [smem:[#allocation14_spill]] %s2862_s0  ;;  %s2553_s26 = smov 0  }
   0x2   :  { %2886 = sst [smem:[#allocation15_spill]] %s2863_s1  ;;  %s2555_s27 = smov 0  }
   0x3   :  { %2887 = sst [smem:[#allocation16_spill]] %s2864_s2  ;;  %s2557_s28 = smov 0  }
   0x4   :  { %2888 = sst [smem:[#allocation17_spill]] %s2865_s3 }
   0x5   :  { %2889 = sst [smem:[#allocation18_spill]] %s2866_s4 }
   0x6   :  { %2890 = sst [smem:[#allocation19_spill]] %s2867_s5 }
   0x7   :  { %2891 = sst [smem:[#allocation20_spill]] %s2871_s9 }
   0x8   :  { %2892 = sst [smem:[#allocation21_spill]] %s2872_s10 }
   0x9   :  { %2893 = sst [smem:[#allocation22_spill]] %s2873_s11 }
   0xa   :  { %2894 = sst [smem:[#allocation23_spill]] %s2877_s15 }
   0xb   :  { %2895 = sst [smem:[#allocation24_spill]] %s2878_s16 }
   0xc   :  { %2896 = sst [smem:[#allocation25_spill]] %s2879_s17 }
   0xd LB: > { %2897 = sst [smem:[#allocation7_spill]] %s2433_s24  ;;  %s36_s29 = sadd.s32 1, %s2441_s26  ;;  %s2449_s28 = sphi %s2557_s28, %s27_s28   ;;  %s2445_s27 = sphi %s2555_s27, %s2936_s27   ;;  %s2441_s26 = sphi %s2553_s26, %s2935_s26   ;;  %s2437_s25 = sphi %s2551_s25, %s2934_s25   ;;  %s2433_s24 = sphi %s2549_s24, %s2933_s24  }
   0xe   : > { %2898 = sst [smem:[#allocation8_spill]] %s2441_s26  ;;  %s39_s0 = sadd.s32 1, %s2445_s27 }
   0xf   : > { %2899 = sst [smem:[#allocation9_spill]] %s2445_s27  ;;  %p37_p0 = scmp.ge.s32.totalorder %s36_s29, 2 }
  0x10   : > { %2900 = sst [smem:[#allocation10_spill]] %s2449_s28  ;;  %p2082_p1 = scmp.ge.s32.totalorder %s2449_s28, 1 }
  0x11   : > { %p638_p2 = scmp.lt.s32.totalorder %s2449_s28, 5  ;;  %s2938_s29 = smov (%p37_p0, %s36_s29), 0 }
  0x12   : > { %2901 = sst [smem:[#allocation11_spill]] %s2938_s29  ;;  %s2940_s0 = smov (!%p37_p0, %s39_s0), %s2445_s27 }
  0x13   : > { %p639_p3 = pnand %p2082_p1, %p638_p2  ;;  %p41_p4 = scmp.ge.s32.totalorder %s2940_s0, 2 }
  0x15   : > { %s2942_s0 = smov (%p41_p4, %s2940_s0), 0  ;;  %642 = sbr.rel (%p639_p3) target bundleno = 2527 (0x9df), region = 88 }
  0x16   : > { %2902 = sst [smem:[#allocation12_spill]] %s2942_s0 }
  0x1a   : > { %p748_p5 = scmp.lt.s32.totalorder %s2437_s25, 1  ;;  %p752_p6 = scmp.lt.s32.totalorder %s2433_s24, 1 }
  0x1b   : > { %s2903_s20 = sld [smem:[#allocation14_spill]] }
  0x1c   : > { %s2944_s25 = smov (!%p748_p5, %s2437_s25), 1  ;;  %s2906_s3 = sld [smem:[#allocation17_spill]] }
  0x1d   : > { %s2583_s30 = scalar_select %p752_p6, %s2433_s24, 1 }
  0x1e   : > { %s2083_s18 = sshll.u32 %s2944_s25, 3  ;;  %s2907_s4 = sld [smem:[#allocation18_spill]] }
  0x1f   : > { %s2155_s24 = sshll.u32 %s2583_s30, 4  ;;  %s2908_s5 = sld [smem:[#allocation19_spill]] }
  0x20   : > { %s2910_s9 = sld [smem:[#allocation20_spill]]  ;;  %s2644_s17 = scalar_lea.vmem %s2875_s13, %s2155_s24 }
  0x21   : > { %s751_s21 = scalar_lea.vmem %s2903_s20, %s2083_s18  ;;  %s803_s2 = scalar_lea.vmem %s2876_s14, %s2583_s30 }
  0x22   : > { %s2600_s25 = scalar_lea.vmem %s2906_s3, %s2155_s24  ;;  %s2914_s26 = sld [smem:[#allocation23_spill]] }
  0x23   : > { %s2915_s29 = sld [smem:[#allocation25_spill]] }
  0x24   : > { %s2605_s1 = scalar_lea.vmem %s2907_s4, %s2155_s24 }
  0x25   : > { %s2610_s0 = scalar_lea.vmem %s2908_s5, %s2155_s24  ;;  %s2913_s5 = sld [smem:[#allocation24_spill]] }
  0x26   : > { %2909 = sst [smem:[#allocation13_spill]] %s2610_s0  ;;  %s2627_s4 = scalar_lea.vmem %s2910_s9, %s2155_s24 }
  0x27   : > { %s2160_s9 = sshll.u32 %s2583_s30, 6  ;;  %s2916_s24 = sld [smem:[#allocation7_spill]] }
  0x28   : > { %s2658_s11 = scalar_lea.vmem %s2914_s26, %s2160_s9 }
  0x29   : > { %s2663_s15 = scalar_lea.vmem %s2915_s29, %s2083_s18 }
  0x2b   : > { %s811_s10 = scalar_lea.vmem %s2913_s5, %s2583_s30 }
  0x2d   : > { %p2097_p7 = scmp.ne.s32.totalorder %s2916_s24, 0 }
  0x2f   : > { %820 = sbr.rel (%p2097_p7) target bundleno = 54 (0x36), region = 92 }
  0x34   : > { %v821_v0 = vld [vmem:[%s751_s21] sm:$0xff]  ;;  %vm822_vm0 = vcmask 261120  }
  0x35   : > { %823 = vst.msk [vmem:[#allocation2] sm:$0xff] %vm822_vm0, %v821_v0 }
  0x36 PF: > { %vm827_vm1 = vcmask 261120   ;;  %v2360_v8 = vld [vmem:[%s2600_s25 + $0x8] sm:$0xff]   ;;  %v2451_v9 = vmov 0.0   ;;  %vm2452_vm2 = vmmov 0   ;;  %v2361_v10 = vld [vmem:[%s2600_s25] sm:$0xff]   ;;  %s2917_s5 = sld [smem:[#allocation13_spill]]  ;;  %s2922_s20 = scalar_lea.vmem %s2868_s6, %s2583_s30 }
  0x37   : > { %2204 = vmatprep.subr.bf16.mxu0 %v2451_v9  ;;  %2208 = vmatprep.mubr.msk.bf16.mxu0 %vm2452_vm2, %v2451_v9  ;;  %s2918_s21 = sld [smem:[#allocation15_spill]]  ;;  %v2362_v20 = vld [vmem:[%s2605_s1 + $0x8] sm:$0xff]   ;;  %v2363_v22 = vld [vmem:[%s2605_s1] sm:$0xff]   ;;  %vm924_vm3 = vcmask 257024   ;;  %s2923_s23 = scalar_lea.vmem %s2869_s7, %s2583_s30  ;;  %vm1059_vm4 = vcmask 64512   ;;  %vm1121_vm5 = vcmask 1043456  }
  0x38   : > { %2205 = vmatpush3.bf16.msra.mxu0 %v2360_v8  ;;  %2228 = vmatprep.subr.bf16.mxu1 %v2451_v9  ;;  %s2920_s3 = sld [smem:[#allocation16_spill]]  ;;  %v2100_v25 = vld [vmem:[%s2922_s20] ss:$0 sm:$0xff]  ;;  %s2924_s24 = scalar_lea.vmem %s2870_s8, %s2583_s30  ;;  %vm1166_vm6 = vcmask 60416   ;;  %vm1297_vm7 = vcmask 126016   ;;  %vm1428_vm8 = vcmask 191616  }
  0x39   : > { %2206 = vmatprep.subr.bf16.mxu0 %v2451_v9  ;;  %2230 = vmatprep.mubr.msk.bf16.mxu1 %vm2452_vm2, %v2451_v9  ;;  %v2104_v32 = vld [vmem:[%s2923_s23] ss:$0 sm:$0xff]  ;;  %s2454_s9 = smov 120   ;;  %s2455_s18 = smov 104   ;;  %vm1559_vm9 = vcmask 257216  }
  0x3a   : > { %v2108_v39 = vld [vmem:[%s2924_s24] ss:$0 sm:$0xff]  ;;  %s2458_s26 = smov 24   ;;  %s2927_s20 = sld [smem:[#allocation22_spill]] }
  0x3c   : > { %v2666_v1 = vld [vmem:[#allocation2] sm:$0xff]  ;;  %2207 = vmatpush3.bf16.msra.mxu0 %v2361_v10  ;;  %v2364_v23 = vld [vmem:[%s2917_s5 + $0x8] sm:$0xff]  }
  0x3d   : > { %v828_v2 = vsel %vm827_vm1, %v2666_v1, 0.0  ;;  %2212 = vmatprep.subr.bf16.mxu0 %v2451_v9  ;;  %s2919_s25 = scalar_lea.vmem %s2918_s21, %s2583_s30  ;;  %v2365_v24 = vld [vmem:[%s2917_s5] sm:$0xff]   ;;  %s2453_s5 = smov 112  }
  0x3e   : > { %829 = vadd.xlane.f32.xlu0 %v828_v2  ;;  %v2098_v15 = vld [vmem:[%s2919_s25] ss:$0 sm:$0xff]  ;;  %s2921_s16 = scalar_lea.vmem %s2920_s3, %s2583_s30  ;;  %s2456_s21 = smov 8  }
  0x3f   : > { %v2099_v17 = vld [vmem:[%s2921_s16] ss:$0 sm:$0xff]  ;;  %s2457_s25 = smov 16   ;;  %s2925_s3 = sld [smem:[#allocation21_spill]] }
  0x40   : > { %s2928_s22 = scalar_lea.vmem %s2927_s20, %s2583_s30 }
  0x45   : > { %s2926_s16 = scalar_lea.vmem %s2925_s3, %s2583_s30 }
  0xc7   : > { %v830_v3 = vpop.xlane.xlu0 %829 }
  0xc8   : > { %v832_v4 = vmul.f32 0.03125, %v830_v3 }
  0xca   : > { %v833_v5 = vsub.f32 %v2666_v1, %v832_v4 }
  0xcc   : > { %v834_v6 = vmul.f32 %v833_v5, %v833_v5 }
  0xce   : > { %v835_v7 = vsel %vm827_vm1, %v834_v6, 0.0 }
  0xcf   : > { %836 = vadd.xlane.f32.xlu0 %v835_v7 }
 0x158   : > { %v837_v11 = vpop.xlane.xlu0 %836 }
 0x159   : > { %v838_v12 = vmul.f32 0.03125, %v837_v11 }
 0x15b   : > { %v839_v13 = vadd.f32 1e-05, %v838_v12 }
 0x15d   : > { %2387 = vrsqrt.f32 %v839_v13 }
 0x16a   : > { %v2388_v14 = vpop.eup %2387 }
 0x16b   : > { %v841_v16 = vmul.f32 %v2388_v14, %v833_v5 }
 0x16d   : > { %v848_v18 = vmul.f32 %v2098_v15, %v841_v16 }
 0x16f   : > { %v855_v19 = vadd.f32 %v2099_v17, %v848_v18 }
 0x171   : > { %v856_v21 = vpack.c.bf16 %v855_v19, %v855_v19 }
 0x173   : > { %2209 = vmatmul.mubr.msk.bf16.vlgmr.msra.gmra.mxu0 %vm827_vm1, %v856_v21 }
 0x174   : > { %2213 = vmatpush3.bf16.msra.mxu0 %v2362_v20  ;;  %2216 = vmatprep.mubr.msk.bf16.mxu0 %vm2452_vm2, %v2451_v9 }
 0x175   : > { %2214 = vmatprep.subr.bf16.mxu0 %v2451_v9 }
 0x178   : > { %2215 = vmatpush3.bf16.msra.mxu0 %v2363_v22 }
 0x179   : > { %2220 = vmatprep.subr.bf16.mxu0 %v2451_v9 }
 0x17b   : > { %2217 = vmatmul.mubr.msk.bf16.vlgmr.msra.gmra.mxu0 %vm827_vm1, %v856_v21 }
 0x17c   : > { %2221 = vmatpush3.bf16.msra.mxu0 %v2364_v23  ;;  %2224 = vmatprep.mubr.msk.bf16.mxu0 %vm2452_vm2, %v2451_v9 }
 0x17d   : > { %2222 = vmatprep.subr.bf16.mxu0 %v2451_v9 }
 0x180   : > { %2223 = vmatpush3.bf16.msra.mxu0 %v2365_v24 }
 0x181   : > { %2234 = vmatprep.subr.bf16.mxu0 %v2451_v9 }
 0x183   : > { %2225 = vmatmul.mubr.msk.bf16.vlgmr.msra.gmra.mxu0 %vm827_vm1, %v856_v21 }
 0x184   : > { %2236 = vmatprep.mubr.msk.bf16.mxu0 %vm2452_vm2, %v2451_v9 }
 0x233   : > { %v917_v26 = vpop.f32.mrf.mxu0 }
 0x234   : > { %v918_v27 = vadd.f32 %v2100_v25, %v917_v26 }
 0x235   : > { %v2210_v28 = vpop.f32.mrf.mxu0 }
 0x236   : > { %v923_v29 = vpack.c.bf16 %v918_v27, %v918_v27 }
 0x237   : > { %v920_v30 = vpop.f32.mrf.mxu0 }
 0x238   : > { %925 = vst.msk [vmem:[#allocation3] sm:$0xf] %vm924_vm3, %v923_v29 }
 0x239   : > { %v2211_v31 = vpop.f32.mrf.mxu0 }
 0x23b   : > { %v983_v33 = vpop.f32.mrf.mxu0 }
 0x23c   : > { %v984_v34 = vadd.f32 %v2104_v32, %v983_v33 }
 0x23d   : > { %v2218_v35 = vpop.f32.mrf.mxu0 }
 0x23e   : > { %v989_v36 = vpack.c.bf16 %v984_v34, %v984_v34 }
 0x23f   : > { %v986_v37 = vpop.f32.mrf.mxu0  ;;  %v2368_v50 = vld [vmem:[#allocation3] ss:$0 sps:$4 sm:$0xff]  }
 0x240   : > { %990 = vst.msk [vmem:[#allocation4] sm:$0xf] %vm924_vm3, %v989_v36  ;;  %v1056_v51 = vld [vmem:[#allocation3] sm:$0xf] }
 0x241   : > { %v2219_v38 = vpop.f32.mrf.mxu0  ;;  %v2369_v54 = vld [vmem:[#allocation3] ss:$0 sps:$4 sm:$0xff]  }
 0x242   : > { %v2371_v56 = vld [vmem:[#allocation3] ss:$0 sps:$4 sm:$0xff]  }
 0x243   : > { %v1048_v40 = vpop.f32.mrf.mxu0 }
 0x244   : > { %v1049_v41 = vadd.f32 %v2108_v39, %v1048_v40 }
 0x245   : > { %v2226_v42 = vpop.f32.mrf.mxu0 }
 0x246   : > { %v1054_v43 = vpack.c.bf16 %v1049_v41, %v1049_v41 }
 0x247   : > { %v1051_v44 = vpop.f32.mrf.mxu0  ;;  %v1057_v45 = vld [vmem:[#allocation4] sm:$0xf] }
 0x248   : > { %v2366_v46 = vld [vmem:[#allocation4] ss:$0 sps:$4 sm:$0xff]   ;;  %1055 = vst.msk [vmem:[#allocation5] sm:$0xf] %vm924_vm3, %v1054_v43  ;;  %v1064_v47 = vsel %vm1059_vm4, %v1057_v45, 0 }
 0x249   : > { %v2367_v48 = vld [vmem:[#allocation4] ss:$0 sps:$4 sm:$0xff]   ;;  %v2227_v49 = vpop.f32.mrf.mxu0  ;;  %2229 = vmatpush3.bf16.xpose.msra.mxu1 %v1064_v47  ;;  %1310 = vrot.lane.b32.xlu0 %v2366_v46, %s2453_s5 }
 0x24a   : > { %1179 = vrot.lane.b32.xlu1 %v2367_v48, %s2454_s9  ;;  %2240 = vmatprep.subr.bf16.mxu1 %v2451_v9  ;;  %v2370_v55 = vld [vmem:[#allocation4] ss:$0 sps:$4 sm:$0xff]  }
 0x24e   : > { %1174 = vrot.lane.b32.xlu1 %v2368_v50, %s2454_s9 }
 0x24f   : > { %v1058_v52 = vld [vmem:[#allocation5] sm:$0xf] }
 0x250   : > { %2231 = vmatmul.mubr.msk.bf16.vlgmr.msra.gmra.mxu1 %vm1059_vm4, %v1056_v51  ;;  %v1123_v53 = vsel %vm1121_vm5, %v1058_v52, 0  ;;  %v2372_v39 = vld [vmem:[#allocation5] ss:$0 sps:$4 sm:$0xff]  }
 0x251   : > { %2235 = vmatpush3.bf16.msra.mxu0 %v1123_v53  ;;  %2242 = vmatprep.mubr.msk.bf16.mxu1 %vm2452_vm2, %v2451_v9  ;;  %v2373_v43 = vld [vmem:[#allocation5] ss:$0 sps:$4 sm:$0xff]  }
 0x252   : > { %1305 = vrot.lane.b32.xlu1 %v2369_v54, %s2453_s5  ;;  %2246 = vmatprep.subr.bf16.mxu0 %v2451_v9  ;;  %v2374_v50 = vld [vmem:[#allocation5] ss:$0 sps:$4 sm:$0xff]  }
 0x256   : > { %1441 = vrot.lane.b32.xlu1 %v2370_v55, %s2455_s18 }
 0x25a   : > { %1436 = vrot.lane.b32.xlu1 %v2371_v56, %s2455_s18 }
 0x2bb   : > { %v1311_v60 = vpop.permute.xlu0 %1310 }
 0x2bc   : > { %v1180_v57 = vpop.permute.xlu1 %1179  ;;  %v1316_v62 = vsel %vm1059_vm4, %v1311_v60, 0 }
 0x2bd   : > { %v1185_v58 = vsel %vm1059_vm4, %v1180_v57, 0 }
 0x2be   : > { %2241 = vmatpush3.bf16.xpose.msra.mxu1 %v1185_v58 }
 0x2bf   : > { %2252 = vmatprep.subr.bf16.mxu1 %v2451_v9 }
 0x2c0   : > { %v1175_v59 = vpop.permute.xlu1 %1174 }
 0x2c4   : > { %v1306_v61 = vpop.permute.xlu1 %1305 }
 0x2c5   : > { %2243 = vmatmul.mubr.msk.bf16.vlgmr.msra.gmra.mxu1 %vm1059_vm4, %v1175_v59 }
 0x2c6   : > { %2253 = vmatpush3.bf16.xpose.msra.mxu1 %v1316_v62  ;;  %2254 = vmatprep.mubr.msk.bf16.mxu1 %vm2452_vm2, %v2451_v9 }
 0x2c7   : > { %2264 = vmatprep.subr.bf16.mxu1 %v2451_v9 }
 0x2c8   : > { %v1442_v63 = vpop.permute.xlu1 %1441 }
 0x2c9   : > { %v1447_v0 = vsel %vm1059_vm4, %v1442_v63, 0 }
 0x2cc   : > { %v1437_v2 = vpop.permute.xlu1 %1436 }
 0x2cd   : > { %2255 = vmatmul.mubr.msk.bf16.vlgmr.msra.gmra.mxu1 %vm1059_vm4, %v1306_v61 }
 0x2ce   : > { %2265 = vmatpush3.bf16.xpose.msra.mxu1 %v1447_v0  ;;  %2266 = vmatprep.mubr.msk.bf16.mxu1 %vm2452_vm2, %v2451_v9 }
 0x2cf   : > { %2276 = vmatprep.subr.bf16.mxu1 %v2451_v9 }
 0x2d5   : > { %2267 = vmatmul.mubr.msk.bf16.vlgmr.msra.gmra.mxu1 %vm1059_vm4, %v1437_v2 }
 0x2d6   : > { %2280 = vmatprep.mubr.msk.bf16.mxu1 %vm2452_vm2, %v2451_v9 }
 0x310   : > { %v1100_v3 = vpop.f32.mrf.mxu1 }
 0x311   : > { %v1106_v4 = vsel %vm1059_vm4, %v1100_v3, -inf }
 0x312   : > { %1107 = vmax.xlane.f32.xlu1 %v1106_v4  ;;  %v2232_v5 = vpop.f32.mrf.mxu1 }
 0x314   : > { %v1103_v6 = vpop.f32.mrf.mxu1 }
 0x316   : > { %v2233_v7 = vpop.f32.mrf.mxu1 }
 0x385   : > { %v1221_v8 = vpop.f32.mrf.mxu1 }
 0x386   : > { %v1227_v10 = vsel %vm1059_vm4, %v1221_v8, -inf }
 0x387   : > { %1228 = vmax.xlane.f32.xlu0 %v1227_v10  ;;  %v2244_v11 = vpop.f32.mrf.mxu1 }
 0x389   : > { %v1224_v12 = vpop.f32.mrf.mxu1 }
 0x38b   : > { %v2245_v13 = vpop.f32.mrf.mxu1 }
 0x38d   : > { %v1352_v14 = vpop.f32.mrf.mxu1 }
 0x38e   : > { %v1358_v15 = vsel %vm1059_vm4, %v1352_v14, -inf }
 0x38f   : > { %1359 = vmax.xlane.f32.xlu1 %v1358_v15  ;;  %v2256_v16 = vpop.f32.mrf.mxu1 }
 0x391   : > { %v1355_v17 = vpop.f32.mrf.mxu1 }
 0x393   : > { %v2257_v18 = vpop.f32.mrf.mxu1 }
 0x395   : > { %v1483_v19 = vpop.f32.mrf.mxu1 }
 0x396   : > { %v1489_v20 = vsel %vm1059_vm4, %v1483_v19, -inf }
 0x397   : > { %1490 = vmax.xlane.f32.xlu1 %v1489_v20  ;;  %v2268_v21 = vpop.f32.mrf.mxu1 }
 0x399   : > { %v1486_v22 = vpop.f32.mrf.mxu1 }
 0x39a   : > { %v2375_v22 = vld [vmem:[%s2627_s4 + $0x8] sm:$0xff]  }
 0x39b   : > { %v1108_v23 = vpop.xlane.xlu1 %1107  ;;  %v2269_v24 = vpop.f32.mrf.mxu1  ;;  %2277 = vmatpush3.bf16.msra.mxu1 %v2375_v22 }
 0x39c   : > { %v1109_v25 = vsub.f32 %v1100_v3, %v1108_v23  ;;  %v2376_v23 = vld [vmem:[%s2627_s4] sm:$0xff]   ;;  %2278 = vmatprep.subr.bf16.mxu1 %v2451_v9 }
 0x39e   : > { %v1110_v26 = vmul.f32 1.442695, %v1109_v25 }
 0x39f   : > { %2279 = vmatpush3.bf16.msra.mxu1 %v2376_v23 }
 0x3a0   : > { %2389 = vpow2.f32 %v1110_v26  ;;  %2292 = vmatprep.subr.bf16.mxu1 %v2451_v9 }
 0x3ad   : > { %v2390_v27 = vpop.eup %2389 }
 0x3ae   : > { %v1112_v28 = vsel %vm1059_vm4, %v2390_v27, 0.0 }
 0x3af   : > { %1113 = vadd.xlane.f32.xlu0 %v1112_v28 }
 0x410   : > { %v1229_v29 = vpop.xlane.xlu0 %1228 }
 0x411   : > { %v1230_v30 = vsub.f32 %v1221_v8, %v1229_v29 }
 0x413   : > { %v1231_v31 = vmul.f32 1.442695, %v1230_v30 }
 0x415   : > { %2391 = vpow2.f32 %v1231_v31 }
 0x418   : > { %v1360_v32 = vpop.xlane.xlu1 %1359 }
 0x419   : > { %v1361_v33 = vsub.f32 %v1352_v14, %v1360_v32 }
 0x41b   : > { %v1362_v34 = vmul.f32 1.442695, %v1361_v33  ;;  %v2132_v33 = vld [vmem:[%s2926_s16] ss:$0 sm:$0xff] }
 0x41d   : > { %2393 = vpow2.f32 %v1362_v34 }
 0x420   : > { %v1491_v41 = vpop.xlane.xlu1 %1490 }
 0x421   : > { %v1492_v42 = vsub.f32 %v1483_v19, %v1491_v41 }
 0x422   : > { %v2392_v35 = vpop.eup %2391 }
 0x423   : > { %v1233_v36 = vsel %vm1059_vm4, %v2392_v35, 0.0  ;;  %v1493_v44 = vmul.f32 1.442695, %v1492_v42 }
 0x424   : > { %1234 = vadd.xlane.f32.xlu1 %v1233_v36 }
 0x42a   : > { %v2394_v37 = vpop.eup %2393 }
 0x42b   : > { %v1364_v38 = vsel %vm1059_vm4, %v2394_v37, 0.0 }
 0x42c   : > { %1365 = vadd.xlane.f32.xlu0 %v1364_v38 }
 0x435   : > { %1373 = vrot.lane.b32.xlu1 %v2372_v39, %s2453_s5 }
 0x438   : > { %v1114_v40 = vpop.xlane.xlu0 %1113 }
 0x439   : > { %2395 = vrcp.f32 %v1114_v40 }
 0x43a   : > { %2397 = vpow2.f32 %v1493_v44 }
 0x442   : > { %1242 = vrot.lane.b32.xlu0 %v2373_v43, %s2454_s9 }
 0x446   : > { %v2396_v45 = vpop.eup %2395 }
 0x447   : > { %v1116_v46 = vmul.f32 %v2396_v45, %v2390_v27  ;;  %v2398_v48 = vpop.eup %2397 }
 0x448   : > { %v1495_v49 = vsel %vm1059_vm4, %v2398_v48, 0.0 }
 0x449   : > { %v1117_v47 = vpack.c.bf16 %v1116_v46, %v1116_v46  ;;  %v2377_v46 = vld [vmem:[%s2644_s17 + $0x8] sm:$0xff]  }
 0x44b   : > { %2237 = vmatmul.mubr.msk.bf16.vlgmr.msra.gmra.mxu0 %vm1059_vm4, %v1117_v47 }
 0x44c   : > { %2248 = vmatprep.mubr.msk.bf16.mxu0 %vm2452_vm2, %v2451_v9 }
 0x459   : > { %1496 = vadd.xlane.f32.xlu1 %v1495_v49 }
 0x46a   : > { %1504 = vrot.lane.b32.xlu1 %v2374_v50, %s2455_s18 }
 0x4ad   : > { %v1235_v51 = vpop.xlane.xlu1 %1234 }
 0x4ae   : > { %2399 = vrcp.f32 %v1235_v51  ;;  %v2136_v51 = vld [vmem:[%s2928_s22] ss:$0 sm:$0xff] }
 0x4b1   : > { %v1374_v57 = vpop.permute.xlu1 %1373 }
 0x4b2   : > { %v1379_v59 = vsel %vm1121_vm5, %v1374_v57, 0  ;;  %v2379_v57 = vld [vmem:[%s2658_s11 + $0x38] sm:$0xff]  }
 0x4b5   : > { %v1366_v52 = vpop.xlane.xlu0 %1365 }
 0x4b6   : > { %2401 = vrcp.f32 %v1366_v52 }
 0x4b9   : > { %v1243_v53 = vpop.permute.xlu0 %1242 }
 0x4ba   : > { %v1248_v54 = vsel %vm1121_vm5, %v1243_v53, 0 }
 0x4bb   : > { %v2400_v55 = vpop.eup %2399  ;;  %2247 = vmatpush3.bf16.msra.mxu0 %v1248_v54 }
 0x4bc   : > { %2258 = vmatprep.subr.bf16.mxu0 %v2451_v9  ;;  %v1237_v56 = vmul.f32 %v2400_v55, %v2392_v35 }
 0x4be   : > { %v1238_v58 = vpack.c.bf16 %v1237_v56, %v1237_v56 }
 0x4c0   : > { %2249 = vmatmul.mubr.msk.bf16.vlgmr.msra.gmra.mxu0 %vm1059_vm4, %v1238_v58  ;;  %v2380_v58 = vld [vmem:[%s2658_s11 + $0x30] sm:$0xff]  }
 0x4c1   : > { %2259 = vmatpush3.bf16.msra.mxu0 %v1379_v59  ;;  %2260 = vmatprep.mubr.msk.bf16.mxu0 %vm2452_vm2, %v2451_v9  ;;  %v2381_v59 = vld [vmem:[%s2658_s11 + $0x28] sm:$0xff]  }
 0x4c2   : > { %2270 = vmatprep.subr.bf16.mxu0 %v2451_v9 }
 0x4c3   : > { %v2402_v60 = vpop.eup %2401 }
 0x4c4   : > { %v1368_v61 = vmul.f32 %v2402_v60, %v2394_v37  ;;  %v2382_v60 = vld [vmem:[%s2658_s11 + $0x20] sm:$0xff]  }
 0x4c6   : > { %v1369_v62 = vpack.c.bf16 %v1368_v61, %v1368_v61  ;;  %v2383_v61 = vld [vmem:[%s2658_s11 + $0x18] sm:$0xff]  }
 0x4c8   : > { %2261 = vmatmul.mubr.msk.bf16.vlgmr.msra.gmra.mxu0 %vm1059_vm4, %v1369_v62  ;;  %v2384_v62 = vld [vmem:[%s2658_s11 + $0x10] sm:$0xff]  }
 0x4c9   : > { %2272 = vmatprep.mubr.msk.bf16.mxu0 %vm2452_vm2, %v2451_v9 }
 0x4e2   : > { %v1497_v63 = vpop.xlane.xlu1 %1496 }
 0x4e3   : > { %2403 = vrcp.f32 %v1497_v63  ;;  %v2385_v63 = vld [vmem:[%s2658_s11 + $0x8] sm:$0xff]  }
 0x4e6   : > { %v1505_v0 = vpop.permute.xlu1 %1504 }
 0x4e7   : > { %v1510_v2 = vsel %vm1121_vm5, %v1505_v0, 0  ;;  %v2386_v0 = vld [vmem:[%s2658_s11] sm:$0xff]  }
 0x4e8   : > { %2271 = vmatpush3.bf16.msra.mxu0 %v1510_v2  ;;  %v2138_v2 = vld [vmem:[%s803_s2] ss:$0 sm:$0xff]  ;;  %s2931_s2 = sld [smem:[#allocation7_spill]] }
 0x4e9   : > { %2284 = vmatprep.subr.bf16.mxu0 %v2451_v9 }
 0x4ee   : > { %p2152_p8 = scmp.ne.s32.totalorder %s2931_s2, 1 }
 0x4f0   : > { %v2404_v3 = vpop.eup %2403 }
 0x4f1   : > { %v1499_v4 = vmul.f32 %v2404_v3, %v2398_v48 }
 0x4f3   : > { %v1500_v5 = vpack.c.bf16 %v1499_v4, %v1499_v4 }
 0x4f5   : > { %2273 = vmatmul.mubr.msk.bf16.vlgmr.msra.gmra.mxu0 %vm1059_vm4, %v1500_v5 }
 0x4f6   : > { %2288 = vmatprep.mubr.msk.bf16.mxu0 %vm2452_vm2, %v2451_v9  ;;  %2285 = vmatpush3.bf16.msra.mxu0 %v2377_v46 }
 0x4f7   : > { %2286 = vmatprep.subr.bf16.mxu0 %v2451_v9 }
 0x50b   : > { %v1159_v6 = vpop.f32.mrf.mxu0 }
 0x50c   : > { %v1165_v7 = vpack.c.bf16 %v1159_v6, %v1159_v6 }
 0x50d   : > { %v2238_v8 = vpop.f32.mrf.mxu0 }
 0x50e   : > { %1167 = vst.msk [vmem:[#allocation6] sm:$0xf] %vm1166_vm6, %v1165_v7 }
 0x50f   : > { %v1162_v10 = vpop.f32.mrf.mxu0 }
 0x511   : > { %v2239_v11 = vpop.f32.mrf.mxu0 }
 0x580   : > { %v1284_v12 = vpop.f32.mrf.mxu0 }
 0x581   : > { %v2161_v13 = vpack.c.bf16 %v1284_v12, %v1284_v12 }
 0x582   : > { %v2250_v14 = vpop.f32.mrf.mxu0 }
 0x583   : > { %1294 = vrot.lane.b32.xlu0 %v2161_v13, %s2456_s21 }
 0x584   : > { %v1287_v15 = vpop.f32.mrf.mxu0 }
 0x585   : > { %v2143_v15 = vld [vmem:[%s811_s10] ss:$0 sm:$0xff] }
 0x586   : > { %v2251_v16 = vpop.f32.mrf.mxu0 }
 0x588   : > { %v1415_v17 = vpop.f32.mrf.mxu0 }
 0x589   : > { %v2162_v18 = vpack.c.bf16 %v1415_v17, %v1415_v17 }
 0x58a   : > { %v2262_v19 = vpop.f32.mrf.mxu0 }
 0x58b   : > { %1425 = vrot.lane.b32.xlu1 %v2162_v18, %s2457_s25 }
 0x58c   : > { %v1418_v20 = vpop.f32.mrf.mxu0 }
 0x58e   : > { %v2263_v21 = vpop.f32.mrf.mxu0 }
 0x5b5   : > { %v1546_v24 = vpop.f32.mrf.mxu0 }
 0x5b6   : > { %v2163_v25 = vpack.c.bf16 %v1546_v24, %v1546_v24 }
 0x5b7   : > { %v2274_v26 = vpop.f32.mrf.mxu0 }
 0x5b8   : > { %1556 = vrot.lane.b32.xlu0 %v2163_v25, %s2458_s26 }
 0x5b9   : > { %v1549_v27 = vpop.f32.mrf.mxu0 }
 0x5bb   : > { %v2275_v28 = vpop.f32.mrf.mxu0 }
 0x5f5   : > { %v1295_v29 = vpop.permute.xlu0 %1294 }
 0x5f6   : > { %1298 = vst.msk [vmem:[#allocation6] sm:$0xf] %vm1297_vm7, %v1295_v29 }
 0x5fd   : > { %v1426_v30 = vpop.permute.xlu1 %1425 }
 0x5fe   : > { %1429 = vst.msk [vmem:[#allocation6] sm:$0xf] %vm1428_vm8, %v1426_v30 }
 0x62a   : > { %v1557_v31 = vpop.permute.xlu0 %1556 }
 0x62b   : > { %1560 = vst.msk [vmem:[#allocation6] sm:$0xf] %vm1559_vm9, %v1557_v31 }
 0x632   : > { %v1561_v32 = vld [vmem:[#allocation6] sm:$0xf] }
 0x633   : > { %2281 = vmatmul.mubr.msk.bf16.vlgmr.msra.gmra.mxu1 %vm827_vm1, %v1561_v32 }
 0x634   : > { %2308 = vmatprep.mubr.msk.bf16.mxu1 %vm2452_vm2, %v2451_v9  ;;  %2293 = vmatpush3.bf16.msra.mxu1 %v2379_v57 }
 0x635   : > { %2294 = vmatprep.subr.bf16.mxu1 %v2451_v9 }
 0x638   : > { %2295 = vmatpush3.bf16.msra.mxu1 %v2380_v58 }
 0x639   : > { %2296 = vmatprep.subr.bf16.mxu1 %v2451_v9 }
 0x63c   : > { %2297 = vmatpush3.bf16.msra.mxu1 %v2381_v59 }
 0x63d   : > { %2298 = vmatprep.subr.bf16.mxu1 %v2451_v9 }
 0x640   : > { %2299 = vmatpush3.bf16.msra.mxu1 %v2382_v60 }
 0x641   : > { %2300 = vmatprep.subr.bf16.mxu1 %v2451_v9 }
 0x644   : > { %2301 = vmatpush3.bf16.msra.mxu1 %v2383_v61 }
 0x645   : > { %2302 = vmatprep.subr.bf16.mxu1 %v2451_v9 }
 0x648   : > { %2303 = vmatpush3.bf16.msra.mxu1 %v2384_v62 }
 0x649   : > { %2304 = vmatprep.subr.bf16.mxu1 %v2451_v9 }
 0x64c   : > { %2305 = vmatpush3.bf16.msra.mxu1 %v2385_v63 }
 0x64d   : > { %2306 = vmatprep.subr.bf16.mxu1 %v2451_v9 }
 0x650   : > { %2307 = vmatpush3.bf16.msra.mxu1 %v2386_v0 }
 0x6f3   : > { %v1622_v34 = vpop.f32.mrf.mxu1 }
 0x6f4   : > { %v1623_v35 = vadd.f32 %v2132_v33, %v1622_v34 }
 0x6f5   : > { %v2282_v36 = vpop.f32.mrf.mxu1 }
 0x6f6   : > { %v2797_v37 = vadd.f32 %v1623_v35, %v2666_v1  ;;  %v2378_v1 = vld [vmem:[%s2644_s17] sm:$0xff]   ;;  %s2929_s17 = scalar_lea.vmem %s2874_s12, %s2583_s30 }
 0x6f7   : > { %v1625_v38 = vpop.f32.mrf.mxu1  ;;  %2287 = vmatpush3.bf16.msra.mxu0 %v2378_v1  ;;  %v2137_v53 = vld [vmem:[%s2929_s17] ss:$0 sm:$0xff] }
 0x6f8   : > { %v1631_v39 = vsel %vm827_vm1, %v2797_v37, 0.0 }
 0x6f9   : > { %1632 = vadd.xlane.f32.xlu1 %v1631_v39  ;;  %v2283_v40 = vpop.f32.mrf.mxu1 }
 0x782   : > { %v1633_v41 = vpop.xlane.xlu1 %1632 }
 0x783   : > { %v1634_v42 = vmul.f32 0.03125, %v1633_v41 }
 0x785   : > { %v1635_v43 = vsub.f32 %v2797_v37, %v1634_v42 }
 0x787   : > { %v1636_v44 = vmul.f32 %v1635_v43, %v1635_v43 }
 0x789   : > { %v1637_v45 = vsel %vm827_vm1, %v1636_v44, 0.0 }
 0x78a   : > { %1638 = vadd.xlane.f32.xlu0 %v1637_v45 }
 0x813   : > { %v1639_v47 = vpop.xlane.xlu0 %1638 }
 0x814   : > { %v1640_v48 = vmul.f32 0.03125, %v1639_v47 }
 0x816   : > { %v1641_v49 = vadd.f32 1e-05, %v1640_v48 }
 0x818   : > { %2405 = vrsqrt.f32 %v1641_v49 }
 0x825   : > { %v2406_v50 = vpop.eup %2405 }
 0x826   : > { %v1643_v52 = vmul.f32 %v2406_v50, %v1635_v43 }
 0x828   : > { %v1650_v54 = vmul.f32 %v2136_v51, %v1643_v52 }
 0x82a   : > { %v1657_v55 = vadd.f32 %v2137_v53, %v1650_v54 }
 0x82c   : > { %v1658_v56 = vpack.c.bf16 %v1657_v55, %v1657_v55 }
 0x82e   : > { %2289 = vmatmul.mubr.msk.bf16.vlgmr.msra.gmra.mxu0 %vm827_vm1, %v1658_v56 }
 0x8ee   : > { %v1719_v3 = vpop.f32.mrf.mxu0 }
 0x8ef   : > { %v1720_v4 = vadd.f32 %v2138_v2, %v1719_v3 }
 0x8f0   : > { %v2290_v5 = vpop.f32.mrf.mxu0 }
 0x8f1   : > { %v2142_v6 = vmul.f32 -1.702, %v1720_v4 }
 0x8f2   : > { %v1722_v7 = vpop.f32.mrf.mxu0 }
 0x8f3   : > { %v1727_v8 = vmul.f32 1.442695, %v2142_v6 }
 0x8f4   : > { %v2291_v10 = vpop.f32.mrf.mxu0 }
 0x8f5   : > { %2407 = vpow2.f32 %v1727_v8 }
 0x902   : > { %v2408_v11 = vpop.eup %2407 }
 0x903   : > { %v1729_v12 = vadd.f32 1.0, %v2408_v11 }
 0x905   : > { %2409 = vrcp.f32 %v1729_v12 }
 0x912   : > { %v2410_v9 = vpop.eup %2409 }
 0x913   : > { %v1732_v13 = vmul.f32 %v2410_v9, %v1720_v4 }
 0x915   : > { %v1733_v14 = vpack.c.bf16 %v1732_v13, %v1732_v13 }
 0x917   : > { %2309 = vmatmul.mubr.bf16.vlgmr.msra.gmra.mxu1 %v1733_v14 }
 0x9d7   : > { %v1839_v16 = vpop.f32.mrf.mxu1 }
 0x9d8   : > { %v1840_v17 = vadd.f32 %v2143_v15, %v1839_v16 }
 0x9d9   : > { %v2310_v18 = vpop.f32.mrf.mxu1  ;;  %1850 = sbr.rel (%p2152_p8) target bundleno = 2527 (0x9df), region = 96 }
 0x9da   : > { %v1845_v19 = vadd.f32 %v1840_v17, %v2797_v37 }
 0x9db   : > { %v1842_v20 = vpop.f32.mrf.mxu1 }
 0x9dc   : > { %1846 = vst.msk [vmem:[#allocation2] sm:$0xff] %vm827_vm1, %v1845_v19 }
 0x9dd   : > { %v2311_v21 = vpop.f32.mrf.mxu1 }
 0x9de   : > { %1851 = vst.msk [vmem:[%s2663_s15] sm:$0xff] %vm827_vm1, %v1845_v19 }
 0x9df PF: > { %s2932_s9 = sld [smem:[#allocation10_spill]] }
 0x9e0   : > { %s2933_s24 = sld [smem:[#allocation8_spill]] }
 0x9e1   : > { %s2934_s25 = sld [smem:[#allocation9_spill]] }
 0x9e2   : > { %s2935_s26 = sld [smem:[#allocation11_spill]] }
 0x9e3   : > { %s2936_s27 = sld [smem:[#allocation12_spill]] }
 0x9e5   : > { %s27_s28 = sadd.s32 1, %s2932_s9  }
 0x9e6   : > { %p24_p9 = scmp.ge.s32.totalorder %s27_s28, 6  }
 0x9e8   :  { %26 = sbr.rel (!%p24_p9) target bundleno = 13 (0xd), region = 174 }

</bundles_post_ra>
